<compile_context>
chip_gen: v7x
topology: tpu7x:2x2x1
jax: 0.10.0
libtpu: 0.0.40
codegen_flags: <defaults>
</compile_context>

<pallas_src>
import functools

import jax
import jax.numpy as jnp
import numpy as np
from jax.experimental import pallas as pl
from jax.experimental.pallas import tpu as pltpu

BN_EPS = 1e-5


# --------------------------------------------------------------------------
# small helpers
# --------------------------------------------------------------------------
def _vmem_limit_bytes():
    """Half of physical VMEM, capped at 64 MiB (128 MiB parts -> 64, v7x -> 32)."""
    cap = 64 * 1024 * 1024
    try:
        cap = int(getattr(pltpu.get_tpu_info(), "vmem_capacity_bytes", cap))
    except Exception:
        pass
    return max(16 * 1024 * 1024, min(cap // 2, 64 * 1024 * 1024))


def _assert_vmem_budget(lp, cin, cout, itemsize, limit):
    """Whole-image-per-grid-step working-set guard (everything (8,128)-padded)."""
    lanes = -(-lp // 128) * 128
    subs = lambda c: -(-c // 8) * 8
    per_step = lanes * (
        2 * subs(cin) * itemsize       # double-buffered input block
        + 2 * subs(cout) * itemsize    # double-buffered pre-BN output block
        + 4 * subs(cout)               # f32 conv accumulator
        + 4 * subs(cin)                # f32 activation temp (pass B)
        + 2 * subs(cin) * itemsize     # live shifted-tap temporaries
    )
    if per_step > limit // 2:
        # TODO(synk): add halo'd row tiling (manually DMA'd overlapping windows)
        # for spatial extents whose whole padded image does not fit in VMEM.
        raise ValueError(
            f"per-image working set ~{per_step / 2**20:.1f} MiB exceeds the VMEM "
            f"budget ({limit // 2**20} MiB scoped limit); image too large for "
            "whole-image tiles")


def _conv3x3_flat(xin, w_ref, wp):
    """3x3 SAME conv on one flat padded image tile.

    xin: (Cin, Lp) in the matmul dtype, flat index p = row*wp + col over the
    zero-padded image.  w_ref: (9, Cout, Cin).  Returns the f32 (Cout, Lp)
    accumulator (lane-dense, Cout on sublanes).  Each (dy, dx) tap is a lane
    shift of the flat spatial axis; the shift wrap-around only contaminates
    pad-ring positions (masked by the caller).  The 9 accumulating K=Cin
    matmuls avoid any concat over the narrow channel dim and suit v7x's MRB.
    """
    acc = None
    t = 0
    for dy in (-1, 0, 1):
        for dx in (-1, 0, 1):
            off = dy * wp + dx
            # jnp.roll (slice + lane concat) for unambiguous shift semantics;
            # pltpu.roll(xin, shift=(-off) % Lp, axis=1) is the native one-op
            # XLU rotate with identical math.
            tap = xin if off == 0 else jnp.roll(xin, shift=-off, axis=1)
            part = jnp.dot(w_ref[t], tap, preferred_element_type=jnp.float32)
            acc = part if acc is None else acc + part
            t += 1
    return acc


def _masked_stats(acc, maskf, inv_count):
    """Per-tile masked (mean, M2) partials (Chan's parallel-variance inputs)."""
    mean = jnp.sum(acc * maskf, axis=1, keepdims=True) * inv_count    # (Cout, 1)
    d = (acc - mean) * maskf
    m2 = jnp.sum(d * d, axis=1, keepdims=True)                        # (Cout, 1)
    return mean, m2


# --------------------------------------------------------------------------
# kernels
# --------------------------------------------------------------------------
def _make_conv_stats_kernel(wp, inv_count):
    """Pass A: conv1 -> pre-BN activation + packed per-image (mean, M2)."""
    def kernel(x_ref, w_ref, m_ref, pre_ref, st_ref):
        xin = x_ref[0]                                     # (Cin, Lp)
        acc = _conv3x3_flat(xin, w_ref, wp)                # (Cout, Lp) f32
        maskf = m_ref[...]                                 # (1, Lp) f32
        mean, m2 = _masked_stats(acc, maskf, inv_count)
        pre_ref[0] = acc.astype(pre_ref.dtype)
        st_ref[0] = jnp.concatenate([mean, m2], axis=1)    # (Cout, 2)
    return kernel


def _make_bn_relu_conv_stats_kernel(wp, inv_count, matmul_dtype):
    """Pass B: fused BN1 affine + ReLU -> conv2 -> pre-BN + (mean, M2)."""
    def kernel(pre_ref, w_ref, m_ref, sc_ref, sh_ref, out_ref, st_ref):
        maskf = m_ref[...]                                 # (1, Lp) f32
        pre = pre_ref[0].astype(jnp.float32)               # (C1, Lp)
        act = jnp.maximum(pre * sc_ref[...] + sh_ref[...], 0.0)
        # Re-impose the conv zero padding: the BN shift makes pad positions
        # nonzero (and pre-BN pad positions hold shift garbage from pass A).
        act = jnp.where(maskf > 0.5, act, 0.0)
        acc = _conv3x3_flat(act.astype(matmul_dtype), w_ref, wp)
        mean, m2 = _masked_stats(acc, maskf, inv_count)
        out_ref[0] = acc.astype(out_ref.dtype)
        st_ref[0] = jnp.concatenate([mean, m2], axis=1)
    return kernel


def _bn_relu_kernel(pre_ref, sc_ref, sh_ref, o_ref):
    """Pass C: elementwise BN affine + ReLU on a lane-dense (Cout, Lp) block."""
    pre = pre_ref[0].astype(jnp.float32)
    o_ref[0] = jnp.maximum(pre * sc_ref[...] + sh_ref[...], 0.0).astype(o_ref.dtype)


# --------------------------------------------------------------------------
# wrapper
# --------------------------------------------------------------------------
def _bn_affine(stats, gamma, beta, count_per_tile):
    """Chan-combine per-tile (mean, M2) -> BN (scale, shift), each (C, 1) f32."""
    means = stats[..., 0]                                  # (tiles, C)
    m2s = stats[..., 1]                                    # (tiles, C)
    mean = jnp.mean(means, axis=0)                         # equal tile counts
    m2 = jnp.sum(m2s, axis=0) + count_per_tile * jnp.sum((means - mean) ** 2, axis=0)
    var = m2 / (means.shape[0] * count_per_tile)           # biased, like torch BN
    scale = gamma * jax.lax.rsqrt(var + BN_EPS)
    shift = beta - mean * scale
    return (scale.reshape(-1, 1).astype(jnp.float32),
            shift.reshape(-1, 1).astype(jnp.float32))


def _double_conv_bn_relu(x, params, matmul_dtype):
    """ConvBlock: (conv3x3 -> BN(batch stats) -> ReLU) x 2, NCHW in / NCHW out."""
    n, cin, h, w = x.shape
    cout = params["g1"].shape[0]
    hp, wp = h + 2, w + 2
    lp = hp * wp
    mm = matmul_dtype

    limit = _vmem_limit_bytes()
    _assert_vmem_budget(lp, max(cin, cout), cout, jnp.dtype(mm).itemsize, limit)

    # Flat padded channel-first layout: (N, C, Lp), spatial on lanes.
    xflat = jnp.pad(x, ((0, 0), (0, 0), (1, 1), (1, 1))).reshape(n, cin, lp).astype(mm)
    # Valid-position mask (excludes the zero pad ring): drives BN stats masking
    # and re-zeroes the pad ring between the two convs.
    maskf = jnp.pad(jnp.ones((h, w), jnp.float32), ((1, 1), (1, 1))).reshape(1, lp)
    # Weights HWIO -> (tap, Cout, Cin): (Cout, Lp)-oriented, lane-dense matmuls.
    w1 = jnp.transpose(params["w1"], (0, 1, 3, 2)).reshape(9, cout, cin).astype(mm)
    w2 = jnp.transpose(params["w2"], (0, 1, 3, 2)).reshape(9, cout, cout).astype(mm)

    inv_cnt = 1.0 / float(h * w)
    cparams = pltpu.CompilerParams(
        dimension_semantics=("parallel",),   # independent images -> megacore/2 TCs
        vmem_limit_bytes=limit,
    )

    def conv_pass(kernel, in_arrays, in_specs, c_out):
        return pl.pallas_call(
            kernel,
            grid=(n,),
            out_shape=(jax.ShapeDtypeStruct((n, c_out, lp), mm),
                       jax.ShapeDtypeStruct((n, c_out, 2), jnp.float32)),
            in_specs=in_specs,
            out_specs=(pl.BlockSpec((1, c_out, lp), lambda i: (i, 0, 0)),
                       pl.BlockSpec((1, c_out, 2), lambda i: (i, 0, 0))),
            compiler_params=cparams,
        )(*in_arrays)

    # ---- pass A: conv1 + packed per-image BN partials -----------------------
    pre1, st1 = conv_pass(
        _make_conv_stats_kernel(wp, inv_cnt),
        (xflat, w1, maskf),
        [pl.BlockSpec((1, cin, lp), lambda i: (i, 0, 0)),
         pl.BlockSpec((9, cout, cin), lambda i: (0, 0, 0)),
         pl.BlockSpec((1, lp), lambda i: (0, 0))],
        cout)
    sc1, sh1 = _bn_affine(st1, params["g1"], params["bt1"], float(h * w))

    # ---- pass B: fused BN1 + ReLU -> conv2 + packed BN partials --------------
    pre2, st2 = conv_pass(
        _make_bn_relu_conv_stats_kernel(wp, inv_cnt, mm),
        (pre1, w2, maskf, sc1, sh1),
        [pl.BlockSpec((1, cout, lp), lambda i: (i, 0, 0)),
         pl.BlockSpec((9, cout, cout), lambda i: (0, 0, 0)),
         pl.BlockSpec((1, lp), lambda i: (0, 0)),
         pl.BlockSpec((cout, 1), lambda i: (0, 0)),
         pl.BlockSpec((cout, 1), lambda i: (0, 0))],
        cout)
    sc2, sh2 = _bn_affine(st2, params["g2"], params["bt2"], float(h * w))

    # ---- pass C: elementwise BN2 + ReLU (lane-dense) --------------------------
    y = pl.pallas_call(
        _bn_relu_kernel,
        grid=(n,),
        out_shape=jax.ShapeDtypeStruct((n, cout, lp), jnp.float32),
        in_specs=[pl.BlockSpec((1, cout, lp), lambda i: (i, 0, 0)),
                  pl.BlockSpec((cout, 1), lambda i: (0, 0)),
                  pl.BlockSpec((cout, 1), lambda i: (0, 0))],
        out_specs=pl.BlockSpec((1, cout, lp), lambda i: (i, 0, 0)),
        compiler_params=cparams,
    )(pre2, sc2, sh2)

    # Drop the pad ring; back to NCHW.
    return y.reshape(n, cout, hp, wp)[:, :, 1:-1, 1:-1]


def up_block_forward(x1, x2, params, *, matmul_dtype=jnp.bfloat16):
    """UpBlock(bilinear=True).forward(x1, x2); NCHW like the PyTorch module."""
    # F.interpolate(scale_factor=2, mode='nearest-exact') == pixel repeat for x2.
    x1 = jnp.repeat(jnp.repeat(x1, 2, axis=2), 2, axis=3)
    x = jnp.concatenate([x2, x1], axis=1)                  # torch.cat([x2, x1], dim=1)
    # NOTE: conv biases b1/b2 are intentionally NOT applied: a per-channel
    # constant added before train-mode BatchNorm cancels exactly (the reference
    # keeps them to prove it).  Only valid for batch-stats (training) BN.
    # TODO(synk): nn.Dropout(p>0) in training mode is stochastic (torch RNG, not
    # reproducible); identity here -- exact for dropout_p == 0 or eval mode.
    return _double_conv_bn_relu(x, params, matmul_dtype)


# ---------------- pure-JAX reference (for correctness check) ----------------
def _ref_conv_bn_relu(x, w_hwio, b, g, bt, matmul_dtype):
    y = jax.lax.conv_general_dilated(
        x.astype(matmul_dtype), w_hwio.astype(matmul_dtype),
        window_strides=(1, 1), padding="SAME",
        dimension_numbers=("NCHW", "HWIO", "NCHW"),
        preferred_element_type=jnp.float32)
    y = y + b.reshape(1, -1, 1, 1)   # bias kept: it must cancel under train-mode BN
    mean = y.mean(axis=(0, 2, 3), keepdims=True)
    var = ((y - mean) ** 2).mean(axis=(0, 2, 3), keepdims=True)
    y = (y - mean) * jax.lax.rsqrt(var + BN_EPS) * g.reshape(1, -1, 1, 1) \
        + bt.reshape(1, -1, 1, 1)
    return jnp.maximum(y, 0.0)


def up_block_reference(x1, x2, params, matmul_dtype=jnp.float32):
    x1 = jnp.repeat(jnp.repeat(x1, 2, axis=2), 2, axis=3)
    x = jnp.concatenate([x2, x1], axis=1)
    h = _ref_conv_bn_relu(x, params["w1"], params["b1"], params["g1"],
                          params["bt1"], matmul_dtype)
    return _ref_conv_bn_relu(h, params["w2"], params["b2"], params["g2"],
                             params["bt2"], matmul_dtype)


if __name__ == "__main__":
    # UpBlock(in_channels1=8, in_channels2=4, out_channels=16, dropout_p=0.0)
    c1, c2, out_c = 8, 4, 16
    cin = c1 + c2
    n, h1, w1 = 2, 8, 8                      # x1 is the low-resolution feature map

    key = jax.random.PRNGKey(0)
    ks = jax.random.split(key, 10)
    params = {
        "w1": 0.1 * jax.random.normal(ks[0], (3, 3, cin, out_c), jnp.float32),
        "b1": 0.1 * jax.random.normal(ks[1], (out_c,), jnp.float32),
        "g1": 1.0 + 0.1 * jax.random.normal(ks[2], (out_c,), jnp.float32),
        "bt1": 0.1 * jax.random.normal(ks[3], (out_c,), jnp.float32),
        "w2": 0.1 * jax.random.normal(ks[4], (3, 3, out_c, out_c), jnp.float32),
        "b2": 0.1 * jax.random.normal(ks[5], (out_c,), jnp.float32),
        "g2": 1.0 + 0.1 * jax.random.normal(ks[6], (out_c,), jnp.float32),
        "bt2": 0.1 * jax.random.normal(ks[7], (out_c,), jnp.float32),
    }
    x1 = jax.random.normal(ks[8], (n, c1, h1, w1), jnp.float32)             # NCHW
    x2 = jax.random.normal(ks[9], (n, c2, 2 * h1, 2 * w1), jnp.float32)     # NCHW

    def run(dtype):
        fn = functools.partial(up_block_forward, matmul_dtype=dtype)
        return jax.block_until_ready(jax.jit(fn)(x1, x2, params))

    # bf16 MXU path vs a reference that also feeds bf16 to its convs.  Tolerance
    # is loose only because the kernel additionally rounds the stored pre-BN
    # activations to bf16 (one extra ~0.4%-relative rounding per layer).
    out = run(jnp.bfloat16)
    assert out.shape == (n, out_c, 2 * h1, 2 * w1), out.shape
    ref = np.asarray(up_block_reference(x1, x2, params, matmul_dtype=jnp.bfloat16))
    assert np.allclose(np.asarray(out), ref, rtol=5e-2, atol=7.5e-2), (
        "bf16 path mismatch vs reference, max err "
        f"{np.abs(np.asarray(out) - ref).max()}")

    # f32 path: exact-math check of the layout / shift-conv / fused-BN structure.
    out32 = run(jnp.float32)
    ref32 = np.asarray(up_block_reference(x1, x2, params, matmul_dtype=jnp.float32))
    assert np.allclose(np.asarray(out32), ref32, rtol=1e-3, atol=1e-3), (
        "f32 path mismatch vs reference, max err "
        f"{np.abs(np.asarray(out32) - ref32).max()}")

    print("KERNEL_OK")
</pallas_src>

<mosaic_0001>
module attributes {stable_mosaic.version = 11 : i64} {
  func.func @kernel(%arg0: i32, %arg1: memref<1x12x324xbf16, #tpu.memory_space<vmem>>, %arg2: memref<9x16x12xbf16, #tpu.memory_space<vmem>>, %arg3: memref<1x324xf32, #tpu.memory_space<vmem>>, %arg4: memref<1x16x324xbf16, #tpu.memory_space<vmem>>, %arg5: memref<1x16x2xf32, #tpu.memory_space<vmem>>) attributes {dimension_semantics = [#tpu.dimension_semantics<parallel>], iteration_bounds = array<i64: 2>, scalar_prefetch = 0 : i64, scratch_operands = 0 : i64, tpu.core_type = #tpu.core_type<tc>, window_params = [{transform_indices = @transform_0, window_bounds = array<i64: 1, 12, 324>}, {pipeline_mode = #tpu.pipeline_mode<synchronous>, transform_indices = @transform_1, window_bounds = array<i64: 9, 16, 12>}, {pipeline_mode = #tpu.pipeline_mode<synchronous>, transform_indices = @transform_2, window_bounds = array<i64: 1, 324>}, {transform_indices = @transform_3, window_bounds = array<i64: 1, 16, 324>}, {transform_indices = @transform_4, window_bounds = array<i64: 1, 16, 2>}]} {
    %c0 = arith.constant 0 : index
    %c0_0 = arith.constant 0 : index
    %c0_1 = arith.constant 0 : index
    %0 = vector.load %arg1[%c0, %c0_0, %c0_1] : memref<1x12x324xbf16, #tpu.memory_space<vmem>>, vector<1x12x324xbf16>
    %1 = vector.shape_cast %0 : vector<1x12x324xbf16> to vector<12x324xbf16>
    %2 = vector.extract_strided_slice %1 {offsets = [0, 305], sizes = [12, 19], strides = [1, 1]} : vector<12x324xbf16> to vector<12x19xbf16>
    %3 = vector.extract_strided_slice %1 {offsets = [0, 0], sizes = [12, 305], strides = [1, 1]} : vector<12x324xbf16> to vector<12x305xbf16>
    %4 = tpu.concatenate %2, %3 in 1 : vector<12x19xbf16>, vector<12x305xbf16> -> vector<12x324xbf16>
    %c0_2 = arith.constant 0 : index
    %c0_3 = arith.constant 0 : index
    %c0_4 = arith.constant 0 : index
    %5 = vector.load %arg2[%c0_2, %c0_3, %c0_4] : memref<9x16x12xbf16, #tpu.memory_space<vmem>>, vector<1x16x12xbf16>
    %6 = vector.shape_cast %5 : vector<1x16x12xbf16> to vector<16x12xbf16>
    %cst = arith.constant dense<0.000000e+00> : vector<16x324xf32>
    %7 = tpu.matmul %6, %4, %cst {dimension_numbers = #tpu.dot_dimension_numbers<[1], [0], [0], [1], [0, 0, 1, 1], [], []>} : vector<16x12xbf16>, vector<12x324xbf16>, vector<16x324xf32> -> vector<16x324xf32>
    %8 = vector.extract_strided_slice %1 {offsets = [0, 306], sizes = [12, 18], strides = [1, 1]} : vector<12x324xbf16> to vector<12x18xbf16>
    %9 = vector.extract_strided_slice %1 {offsets = [0, 0], sizes = [12, 306], strides = [1, 1]} : vector<12x324xbf16> to vector<12x306xbf16>
    %10 = tpu.concatenate %8, %9 in 1 : vector<12x18xbf16>, vector<12x306xbf16> -> vector<12x324xbf16>
    %c1 = arith.constant 1 : index
    %c0_5 = arith.constant 0 : index
    %c0_6 = arith.constant 0 : index
    %11 = vector.load %arg2[%c1, %c0_5, %c0_6] : memref<9x16x12xbf16, #tpu.memory_space<vmem>>, vector<1x16x12xbf16>
    %12 = vector.shape_cast %11 : vector<1x16x12xbf16> to vector<16x12xbf16>
    %cst_7 = arith.constant dense<0.000000e+00> : vector<16x324xf32>
    %13 = tpu.matmul %12, %10, %cst_7 {dimension_numbers = #tpu.dot_dimension_numbers<[1], [0], [0], [1], [0, 0, 1, 1], [], []>} : vector<16x12xbf16>, vector<12x324xbf16>, vector<16x324xf32> -> vector<16x324xf32>
    %14 = arith.addf %7, %13 : vector<16x324xf32>
    %15 = vector.extract_strided_slice %1 {offsets = [0, 307], sizes = [12, 17], strides = [1, 1]} : vector<12x324xbf16> to vector<12x17xbf16>
    %16 = vector.extract_strided_slice %1 {offsets = [0, 0], sizes = [12, 307], strides = [1, 1]} : vector<12x324xbf16> to vector<12x307xbf16>
    %17 = tpu.concatenate %15, %16 in 1 : vector<12x17xbf16>, vector<12x307xbf16> -> vector<12x324xbf16>
    %c2 = arith.constant 2 : index
    %c0_8 = arith.constant 0 : index
    %c0_9 = arith.constant 0 : index
    %18 = vector.load %arg2[%c2, %c0_8, %c0_9] : memref<9x16x12xbf16, #tpu.memory_space<vmem>>, vector<1x16x12xbf16>
    %19 = vector.shape_cast %18 : vector<1x16x12xbf16> to vector<16x12xbf16>
    %cst_10 = arith.constant dense<0.000000e+00> : vector<16x324xf32>
    %20 = tpu.matmul %19, %17, %cst_10 {dimension_numbers = #tpu.dot_dimension_numbers<[1], [0], [0], [1], [0, 0, 1, 1], [], []>} : vector<16x12xbf16>, vector<12x324xbf16>, vector<16x324xf32> -> vector<16x324xf32>
    %21 = arith.addf %14, %20 : vector<16x324xf32>
    %22 = vector.extract_strided_slice %1 {offsets = [0, 323], sizes = [12, 1], strides = [1, 1]} : vector<12x324xbf16> to vector<12x1xbf16>
    %23 = vector.extract_strided_slice %1 {offsets = [0, 0], sizes = [12, 323], strides = [1, 1]} : vector<12x324xbf16> to vector<12x323xbf16>
    %24 = tpu.concatenate %22, %23 in 1 : vector<12x1xbf16>, vector<12x323xbf16> -> vector<12x324xbf16>
    %c3 = arith.constant 3 : index
    %c0_11 = arith.constant 0 : index
    %c0_12 = arith.constant 0 : index
    %25 = vector.load %arg2[%c3, %c0_11, %c0_12] : memref<9x16x12xbf16, #tpu.memory_space<vmem>>, vector<1x16x12xbf16>
    %26 = vector.shape_cast %25 : vector<1x16x12xbf16> to vector<16x12xbf16>
    %cst_13 = arith.constant dense<0.000000e+00> : vector<16x324xf32>
    %27 = tpu.matmul %26, %24, %cst_13 {dimension_numbers = #tpu.dot_dimension_numbers<[1], [0], [0], [1], [0, 0, 1, 1], [], []>} : vector<16x12xbf16>, vector<12x324xbf16>, vector<16x324xf32> -> vector<16x324xf32>
    %28 = arith.addf %21, %27 : vector<16x324xf32>
    %c4 = arith.constant 4 : index
    %c0_14 = arith.constant 0 : index
    %c0_15 = arith.constant 0 : index
    %29 = vector.load %arg2[%c4, %c0_14, %c0_15] : memref<9x16x12xbf16, #tpu.memory_space<vmem>>, vector<1x16x12xbf16>
    %30 = vector.shape_cast %29 : vector<1x16x12xbf16> to vector<16x12xbf16>
    %cst_16 = arith.constant dense<0.000000e+00> : vector<16x324xf32>
    %31 = tpu.matmul %30, %1, %cst_16 {dimension_numbers = #tpu.dot_dimension_numbers<[1], [0], [0], [1], [0, 0, 1, 1], [], []>} : vector<16x12xbf16>, vector<12x324xbf16>, vector<16x324xf32> -> vector<16x324xf32>
    %32 = arith.addf %28, %31 : vector<16x324xf32>
    %33 = vector.extract_strided_slice %1 {offsets = [0, 1], sizes = [12, 323], strides = [1, 1]} : vector<12x324xbf16> to vector<12x323xbf16>
    %34 = vector.extract_strided_slice %1 {offsets = [0, 0], sizes = [12, 1], strides = [1, 1]} : vector<12x324xbf16> to vector<12x1xbf16>
    %35 = tpu.concatenate %33, %34 in 1 : vector<12x323xbf16>, vector<12x1xbf16> -> vector<12x324xbf16>
    %c5 = arith.constant 5 : index
    %c0_17 = arith.constant 0 : index
    %c0_18 = arith.constant 0 : index
    %36 = vector.load %arg2[%c5, %c0_17, %c0_18] : memref<9x16x12xbf16, #tpu.memory_space<vmem>>, vector<1x16x12xbf16>
    %37 = vector.shape_cast %36 : vector<1x16x12xbf16> to vector<16x12xbf16>
    %cst_19 = arith.constant dense<0.000000e+00> : vector<16x324xf32>
    %38 = tpu.matmul %37, %35, %cst_19 {dimension_numbers = #tpu.dot_dimension_numbers<[1], [0], [0], [1], [0, 0, 1, 1], [], []>} : vector<16x12xbf16>, vector<12x324xbf16>, vector<16x324xf32> -> vector<16x324xf32>
    %39 = arith.addf %32, %38 : vector<16x324xf32>
    %40 = vector.extract_strided_slice %1 {offsets = [0, 17], sizes = [12, 307], strides = [1, 1]} : vector<12x324xbf16> to vector<12x307xbf16>
    %41 = vector.extract_strided_slice %1 {offsets = [0, 0], sizes = [12, 17], strides = [1, 1]} : vector<12x324xbf16> to vector<12x17xbf16>
    %42 = tpu.concatenate %40, %41 in 1 : vector<12x307xbf16>, vector<12x17xbf16> -> vector<12x324xbf16>
    %c6 = arith.constant 6 : index
    %c0_20 = arith.constant 0 : index
    %c0_21 = arith.constant 0 : index
    %43 = vector.load %arg2[%c6, %c0_20, %c0_21] : memref<9x16x12xbf16, #tpu.memory_space<vmem>>, vector<1x16x12xbf16>
    %44 = vector.shape_cast %43 : vector<1x16x12xbf16> to vector<16x12xbf16>
    %cst_22 = arith.constant dense<0.000000e+00> : vector<16x324xf32>
    %45 = tpu.matmul %44, %42, %cst_22 {dimension_numbers = #tpu.dot_dimension_numbers<[1], [0], [0], [1], [0, 0, 1, 1], [], []>} : vector<16x12xbf16>, vector<12x324xbf16>, vector<16x324xf32> -> vector<16x324xf32>
    %46 = arith.addf %39, %45 : vector<16x324xf32>
    %47 = vector.extract_strided_slice %1 {offsets = [0, 18], sizes = [12, 306], strides = [1, 1]} : vector<12x324xbf16> to vector<12x306xbf16>
    %48 = vector.extract_strided_slice %1 {offsets = [0, 0], sizes = [12, 18], strides = [1, 1]} : vector<12x324xbf16> to vector<12x18xbf16>
    %49 = tpu.concatenate %47, %48 in 1 : vector<12x306xbf16>, vector<12x18xbf16> -> vector<12x324xbf16>
    %c7 = arith.constant 7 : index
    %c0_23 = arith.constant 0 : index
    %c0_24 = arith.constant 0 : index
    %50 = vector.load %arg2[%c7, %c0_23, %c0_24] : memref<9x16x12xbf16, #tpu.memory_space<vmem>>, vector<1x16x12xbf16>
    %51 = vector.shape_cast %50 : vector<1x16x12xbf16> to vector<16x12xbf16>
    %cst_25 = arith.constant dense<0.000000e+00> : vector<16x324xf32>
    %52 = tpu.matmul %51, %49, %cst_25 {dimension_numbers = #tpu.dot_dimension_numbers<[1], [0], [0], [1], [0, 0, 1, 1], [], []>} : vector<16x12xbf16>, vector<12x324xbf16>, vector<16x324xf32> -> vector<16x324xf32>
    %53 = arith.addf %46, %52 : vector<16x324xf32>
    %54 = vector.extract_strided_slice %1 {offsets = [0, 19], sizes = [12, 305], strides = [1, 1]} : vector<12x324xbf16> to vector<12x305xbf16>
    %55 = vector.extract_strided_slice %1 {offsets = [0, 0], sizes = [12, 19], strides = [1, 1]} : vector<12x324xbf16> to vector<12x19xbf16>
    %56 = tpu.concatenate %54, %55 in 1 : vector<12x305xbf16>, vector<12x19xbf16> -> vector<12x324xbf16>
    %c8 = arith.constant 8 : index
    %c0_26 = arith.constant 0 : index
    %c0_27 = arith.constant 0 : index
    %57 = vector.load %arg2[%c8, %c0_26, %c0_27] : memref<9x16x12xbf16, #tpu.memory_space<vmem>>, vector<1x16x12xbf16>
    %58 = vector.shape_cast %57 : vector<1x16x12xbf16> to vector<16x12xbf16>
    %cst_28 = arith.constant dense<0.000000e+00> : vector<16x324xf32>
    %59 = tpu.matmul %58, %56, %cst_28 {dimension_numbers = #tpu.dot_dimension_numbers<[1], [0], [0], [1], [0, 0, 1, 1], [], []>} : vector<16x12xbf16>, vector<12x324xbf16>, vector<16x324xf32> -> vector<16x324xf32>
    %60 = arith.addf %53, %59 : vector<16x324xf32>
    %c0_29 = arith.constant 0 : index
    %c0_30 = arith.constant 0 : index
    %61 = vector.load %arg3[%c0_29, %c0_30] : memref<1x324xf32, #tpu.memory_space<vmem>>, vector<1x324xf32>
    %62 = vector.broadcast %61 : vector<1x324xf32> to vector<16x324xf32>
    %63 = arith.mulf %60, %62 : vector<16x324xf32>
    %cst_31 = arith.constant dense<0.000000e+00> : vector<16xf32>
    %64 = vector.multi_reduction <add>, %63, %cst_31 [1] : vector<16x324xf32> to vector<16xf32>
    %65 = vector.shape_cast %64 : vector<16xf32> to vector<16x1xf32>
    %cst_32 = arith.constant 3.906250e-03 : f32
    %66 = vector.broadcast %cst_32 : f32 to vector<16x1xf32>
    %67 = arith.mulf %65, %66 : vector<16x1xf32>
    %68 = vector.broadcast %67 : vector<16x1xf32> to vector<16x324xf32>
    %69 = arith.subf %60, %68 : vector<16x324xf32>
    %70 = vector.broadcast %61 : vector<1x324xf32> to vector<16x324xf32>
    %71 = arith.mulf %69, %70 : vector<16x324xf32>
    %72 = arith.mulf %71, %71 : vector<16x324xf32>
    %cst_33 = arith.constant dense<0.000000e+00> : vector<16xf32>
    %73 = vector.multi_reduction <add>, %72, %cst_33 [1] : vector<16x324xf32> to vector<16xf32>
    %74 = vector.shape_cast %73 : vector<16xf32> to vector<16x1xf32>
    %75 = arith.truncf %60 : vector<16x324xf32> to vector<16x324xbf16>
    %c0_34 = arith.constant 0 : index
    %c0_35 = arith.constant 0 : index
    %c0_36 = arith.constant 0 : index
    %76 = vector.load %arg4[%c0_34, %c0_35, %c0_36] : memref<1x16x324xbf16, #tpu.memory_space<vmem>>, vector<1x16x324xbf16>
    %77 = vector.shape_cast %76 : vector<1x16x324xbf16> to vector<16x324xbf16>
    %78 = vector.shape_cast %75 : vector<16x324xbf16> to vector<1x16x324xbf16>
    tpu.vector_store %arg4[%c0_34, %c0_35, %c0_36], %78 {strides = array<i32>} : memref<1x16x324xbf16, #tpu.memory_space<vmem>>, vector<1x16x324xbf16>,
    %79 = tpu.concatenate %67, %74 in 1 : vector<16x1xf32>, vector<16x1xf32> -> vector<16x2xf32>
    %c0_37 = arith.constant 0 : index
    %c0_38 = arith.constant 0 : index
    %c0_39 = arith.constant 0 : index
    %80 = vector.load %arg5[%c0_37, %c0_38, %c0_39] : memref<1x16x2xf32, #tpu.memory_space<vmem>>, vector<1x16x2xf32>
    %81 = vector.shape_cast %80 : vector<1x16x2xf32> to vector<16x2xf32>
    %82 = vector.shape_cast %79 : vector<16x2xf32> to vector<1x16x2xf32>
    tpu.vector_store %arg5[%c0_37, %c0_38, %c0_39], %82 {strides = array<i32>} : memref<1x16x2xf32, #tpu.memory_space<vmem>>, vector<1x16x2xf32>,
    return
  }
  func.func @transform_0(%arg0: i32) -> (i32, i32, i32) {
    %c0_i32 = arith.constant 0 : i32
    %c0_i32_0 = arith.constant 0 : i32
    %c0_i32_1 = arith.constant 0 : i32
    return %arg0, %c0_i32, %c0_i32_0 : i32, i32, i32
  }
  func.func @transform_1(%arg0: i32) -> (i32, i32, i32) {
    %c0_i32 = arith.constant 0 : i32
    %c0_i32_0 = arith.constant 0 : i32
    %c0_i32_1 = arith.constant 0 : i32
    %c0_i32_2 = arith.constant 0 : i32
    return %c0_i32, %c0_i32_0, %c0_i32_1 : i32, i32, i32
  }
  func.func @transform_2(%arg0: i32) -> (i32, i32) {
    %c0_i32 = arith.constant 0 : i32
    %c0_i32_0 = arith.constant 0 : i32
    %c0_i32_1 = arith.constant 0 : i32
    return %c0_i32, %c0_i32_0 : i32, i32
  }
  func.func @transform_3(%arg0: i32) -> (i32, i32, i32) {
    %c0_i32 = arith.constant 0 : i32
    %c0_i32_0 = arith.constant 0 : i32
    %c0_i32_1 = arith.constant 0 : i32
    return %arg0, %c0_i32, %c0_i32_0 : i32, i32, i32
  }
  func.func @transform_4(%arg0: i32) -> (i32, i32, i32) {
    %c0_i32 = arith.constant 0 : i32
    %c0_i32_0 = arith.constant 0 : i32
    %c0_i32_1 = arith.constant 0 : i32
    return %arg0, %c0_i32, %c0_i32_0 : i32, i32, i32
  }
}

module attributes {stable_mosaic.version = 11 : i64} {
  func.func @kernel(%arg0: i32, %arg1: memref<1x16x324xbf16, #tpu.memory_space<vmem>>, %arg2: memref<9x16x16xbf16, #tpu.memory_space<vmem>>, %arg3: memref<1x324xf32, #tpu.memory_space<vmem>>, %arg4: memref<16x1xf32, #tpu.memory_space<vmem>>, %arg5: memref<16x1xf32, #tpu.memory_space<vmem>>, %arg6: memref<1x16x324xbf16, #tpu.memory_space<vmem>>, %arg7: memref<1x16x2xf32, #tpu.memory_space<vmem>>) attributes {dimension_semantics = [#tpu.dimension_semantics<parallel>], iteration_bounds = array<i64: 2>, scalar_prefetch = 0 : i64, scratch_operands = 0 : i64, tpu.core_type = #tpu.core_type<tc>, window_params = [{transform_indices = @transform_0, window_bounds = array<i64: 1, 16, 324>}, {pipeline_mode = #tpu.pipeline_mode<synchronous>, transform_indices = @transform_1, window_bounds = array<i64: 9, 16, 16>}, {pipeline_mode = #tpu.pipeline_mode<synchronous>, transform_indices = @transform_2, window_bounds = array<i64: 1, 324>}, {pipeline_mode = #tpu.pipeline_mode<synchronous>, transform_indices = @transform_3, window_bounds = array<i64: 16, 1>}, {pipeline_mode = #tpu.pipeline_mode<synchronous>, transform_indices = @transform_4, window_bounds = array<i64: 16, 1>}, {transform_indices = @transform_5, window_bounds = array<i64: 1, 16, 324>}, {transform_indices = @transform_6, window_bounds = array<i64: 1, 16, 2>}]} {
    %c0 = arith.constant 0 : index
    %c0_0 = arith.constant 0 : index
    %0 = vector.load %arg3[%c0, %c0_0] : memref<1x324xf32, #tpu.memory_space<vmem>>, vector<1x324xf32>
    %c0_1 = arith.constant 0 : index
    %c0_2 = arith.constant 0 : index
    %c0_3 = arith.constant 0 : index
    %1 = vector.load %arg1[%c0_1, %c0_2, %c0_3] : memref<1x16x324xbf16, #tpu.memory_space<vmem>>, vector<1x16x324xbf16>
    %2 = vector.shape_cast %1 : vector<1x16x324xbf16> to vector<16x324xbf16>
    %3 = arith.extf %2 : vector<16x324xbf16> to vector<16x324xf32>
    %c0_4 = arith.constant 0 : index
    %c0_5 = arith.constant 0 : index
    %4 = vector.load %arg4[%c0_4, %c0_5] : memref<16x1xf32, #tpu.memory_space<vmem>>, vector<16x1xf32>
    %5 = vector.broadcast %4 : vector<16x1xf32> to vector<16x324xf32>
    %6 = arith.mulf %3, %5 : vector<16x324xf32>
    %c0_6 = arith.constant 0 : index
    %c0_7 = arith.constant 0 : index
    %7 = vector.load %arg5[%c0_6, %c0_7] : memref<16x1xf32, #tpu.memory_space<vmem>>, vector<16x1xf32>
    %8 = vector.broadcast %7 : vector<16x1xf32> to vector<16x324xf32>
    %9 = arith.addf %6, %8 : vector<16x324xf32>
    %cst = arith.constant 0.000000e+00 : f32
    %10 = vector.broadcast %cst : f32 to vector<16x324xf32>
    %11 = arith.maximumf %9, %10 : vector<16x324xf32>
    %cst_8 = arith.constant 5.000000e-01 : f32
    %12 = vector.broadcast %cst_8 : f32 to vector<1x324xf32>
    %13 = arith.cmpf ogt, %0, %12 : vector<1x324xf32>
    %cst_9 = arith.constant 0.000000e+00 : f32
    %14 = vector.shape_cast %13 : vector<1x324xi1> to vector<1x324xi1>
    %15 = vector.broadcast %14 : vector<1x324xi1> to vector<16x324xi1>
    %16 = vector.broadcast %cst_9 : f32 to vector<16x324xf32>
    %17 = arith.select %15, %11, %16 : vector<16x324xi1>, vector<16x324xf32>
    %18 = arith.truncf %17 : vector<16x324xf32> to vector<16x324xbf16>
    %19 = vector.extract_strided_slice %18 {offsets = [0, 305], sizes = [16, 19], strides = [1, 1]} : vector<16x324xbf16> to vector<16x19xbf16>
    %20 = vector.extract_strided_slice %18 {offsets = [0, 0], sizes = [16, 305], strides = [1, 1]} : vector<16x324xbf16> to vector<16x305xbf16>
    %21 = tpu.concatenate %19, %20 in 1 : vector<16x19xbf16>, vector<16x305xbf16> -> vector<16x324xbf16>
    %c0_10 = arith.constant 0 : index
    %c0_11 = arith.constant 0 : index
    %c0_12 = arith.constant 0 : index
    %22 = vector.load %arg2[%c0_10, %c0_11, %c0_12] : memref<9x16x16xbf16, #tpu.memory_space<vmem>>, vector<1x16x16xbf16>
    %23 = vector.shape_cast %22 : vector<1x16x16xbf16> to vector<16x16xbf16>
    %cst_13 = arith.constant dense<0.000000e+00> : vector<16x324xf32>
    %24 = tpu.matmul %23, %21, %cst_13 {dimension_numbers = #tpu.dot_dimension_numbers<[1], [0], [0], [1], [0, 0, 1, 1], [], []>} : vector<16x16xbf16>, vector<16x324xbf16>, vector<16x324xf32> -> vector<16x324xf32>
    %25 = vector.extract_strided_slice %18 {offsets = [0, 306], sizes = [16, 18], strides = [1, 1]} : vector<16x324xbf16> to vector<16x18xbf16>
    %26 = vector.extract_strided_slice %18 {offsets = [0, 0], sizes = [16, 306], strides = [1, 1]} : vector<16x324xbf16> to vector<16x306xbf16>
    %27 = tpu.concatenate %25, %26 in 1 : vector<16x18xbf16>, vector<16x306xbf16> -> vector<16x324xbf16>
    %c1 = arith.constant 1 : index
    %c0_14 = arith.constant 0 : index
    %c0_15 = arith.constant 0 : index
    %28 = vector.load %arg2[%c1, %c0_14, %c0_15] : memref<9x16x16xbf16, #tpu.memory_space<vmem>>, vector<1x16x16xbf16>
    %29 = vector.shape_cast %28 : vector<1x16x16xbf16> to vector<16x16xbf16>
    %cst_16 = arith.constant dense<0.000000e+00> : vector<16x324xf32>
    %30 = tpu.matmul %29, %27, %cst_16 {dimension_numbers = #tpu.dot_dimension_numbers<[1], [0], [0], [1], [0, 0, 1, 1], [], []>} : vector<16x16xbf16>, vector<16x324xbf16>, vector<16x324xf32> -> vector<16x324xf32>
    %31 = arith.addf %24, %30 : vector<16x324xf32>
    %32 = vector.extract_strided_slice %18 {offsets = [0, 307], sizes = [16, 17], strides = [1, 1]} : vector<16x324xbf16> to vector<16x17xbf16>
    %33 = vector.extract_strided_slice %18 {offsets = [0, 0], sizes = [16, 307], strides = [1, 1]} : vector<16x324xbf16> to vector<16x307xbf16>
    %34 = tpu.concatenate %32, %33 in 1 : vector<16x17xbf16>, vector<16x307xbf16> -> vector<16x324xbf16>
    %c2 = arith.constant 2 : index
    %c0_17 = arith.constant 0 : index
    %c0_18 = arith.constant 0 : index
    %35 = vector.load %arg2[%c2, %c0_17, %c0_18] : memref<9x16x16xbf16, #tpu.memory_space<vmem>>, vector<1x16x16xbf16>
    %36 = vector.shape_cast %35 : vector<1x16x16xbf16> to vector<16x16xbf16>
    %cst_19 = arith.constant dense<0.000000e+00> : vector<16x324xf32>
    %37 = tpu.matmul %36, %34, %cst_19 {dimension_numbers = #tpu.dot_dimension_numbers<[1], [0], [0], [1], [0, 0, 1, 1], [], []>} : vector<16x16xbf16>, vector<16x324xbf16>, vector<16x324xf32> -> vector<16x324xf32>
    %38 = arith.addf %31, %37 : vector<16x324xf32>
    %39 = vector.extract_strided_slice %18 {offsets = [0, 323], sizes = [16, 1], strides = [1, 1]} : vector<16x324xbf16> to vector<16x1xbf16>
    %40 = vector.extract_strided_slice %18 {offsets = [0, 0], sizes = [16, 323], strides = [1, 1]} : vector<16x324xbf16> to vector<16x323xbf16>
    %41 = tpu.concatenate %39, %40 in 1 : vector<16x1xbf16>, vector<16x323xbf16> -> vector<16x324xbf16>
    %c3 = arith.constant 3 : index
    %c0_20 = arith.constant 0 : index
    %c0_21 = arith.constant 0 : index
    %42 = vector.load %arg2[%c3, %c0_20, %c0_21] : memref<9x16x16xbf16, #tpu.memory_space<vmem>>, vector<1x16x16xbf16>
    %43 = vector.shape_cast %42 : vector<1x16x16xbf16> to vector<16x16xbf16>
    %cst_22 = arith.constant dense<0.000000e+00> : vector<16x324xf32>
    %44 = tpu.matmul %43, %41, %cst_22 {dimension_numbers = #tpu.dot_dimension_numbers<[1], [0], [0], [1], [0, 0, 1, 1], [], []>} : vector<16x16xbf16>, vector<16x324xbf16>, vector<16x324xf32> -> vector<16x324xf32>
    %45 = arith.addf %38, %44 : vector<16x324xf32>
    %c4 = arith.constant 4 : index
    %c0_23 = arith.constant 0 : index
    %c0_24 = arith.constant 0 : index
    %46 = vector.load %arg2[%c4, %c0_23, %c0_24] : memref<9x16x16xbf16, #tpu.memory_space<vmem>>, vector<1x16x16xbf16>
    %47 = vector.shape_cast %46 : vector<1x16x16xbf16> to vector<16x16xbf16>
    %cst_25 = arith.constant dense<0.000000e+00> : vector<16x324xf32>
    %48 = tpu.matmul %47, %18, %cst_25 {dimension_numbers = #tpu.dot_dimension_numbers<[1], [0], [0], [1], [0, 0, 1, 1], [], []>} : vector<16x16xbf16>, vector<16x324xbf16>, vector<16x324xf32> -> vector<16x324xf32>
    %49 = arith.addf %45, %48 : vector<16x324xf32>
    %50 = vector.extract_strided_slice %18 {offsets = [0, 1], sizes = [16, 323], strides = [1, 1]} : vector<16x324xbf16> to vector<16x323xbf16>
    %51 = vector.extract_strided_slice %18 {offsets = [0, 0], sizes = [16, 1], strides = [1, 1]} : vector<16x324xbf16> to vector<16x1xbf16>
    %52 = tpu.concatenate %50, %51 in 1 : vector<16x323xbf16>, vector<16x1xbf16> -> vector<16x324xbf16>
    %c5 = arith.constant 5 : index
    %c0_26 = arith.constant 0 : index
    %c0_27 = arith.constant 0 : index
    %53 = vector.load %arg2[%c5, %c0_26, %c0_27] : memref<9x16x16xbf16, #tpu.memory_space<vmem>>, vector<1x16x16xbf16>
    %54 = vector.shape_cast %53 : vector<1x16x16xbf16> to vector<16x16xbf16>
    %cst_28 = arith.constant dense<0.000000e+00> : vector<16x324xf32>
    %55 = tpu.matmul %54, %52, %cst_28 {dimension_numbers = #tpu.dot_dimension_numbers<[1], [0], [0], [1], [0, 0, 1, 1], [], []>} : vector<16x16xbf16>, vector<16x324xbf16>, vector<16x324xf32> -> vector<16x324xf32>
    %56 = arith.addf %49, %55 : vector<16x324xf32>
    %57 = vector.extract_strided_slice %18 {offsets = [0, 17], sizes = [16, 307], strides = [1, 1]} : vector<16x324xbf16> to vector<16x307xbf16>
    %58 = vector.extract_strided_slice %18 {offsets = [0, 0], sizes = [16, 17], strides = [1, 1]} : vector<16x324xbf16> to vector<16x17xbf16>
    %59 = tpu.concatenate %57, %58 in 1 : vector<16x307xbf16>, vector<16x17xbf16> -> vector<16x324xbf16>
    %c6 = arith.constant 6 : index
    %c0_29 = arith.constant 0 : index
    %c0_30 = arith.constant 0 : index
    %60 = vector.load %arg2[%c6, %c0_29, %c0_30] : memref<9x16x16xbf16, #tpu.memory_space<vmem>>, vector<1x16x16xbf16>
    %61 = vector.shape_cast %60 : vector<1x16x16xbf16> to vector<16x16xbf16>
    %cst_31 = arith.constant dense<0.000000e+00> : vector<16x324xf32>
    %62 = tpu.matmul %61, %59, %cst_31 {dimension_numbers = #tpu.dot_dimension_numbers<[1], [0], [0], [1], [0, 0, 1, 1], [], []>} : vector<16x16xbf16>, vector<16x324xbf16>, vector<16x324xf32> -> vector<16x324xf32>
    %63 = arith.addf %56, %62 : vector<16x324xf32>
    %64 = vector.extract_strided_slice %18 {offsets = [0, 18], sizes = [16, 306], strides = [1, 1]} : vector<16x324xbf16> to vector<16x306xbf16>
    %65 = vector.extract_strided_slice %18 {offsets = [0, 0], sizes = [16, 18], strides = [1, 1]} : vector<16x324xbf16> to vector<16x18xbf16>
    %66 = tpu.concatenate %64, %65 in 1 : vector<16x306xbf16>, vector<16x18xbf16> -> vector<16x324xbf16>
    %c7 = arith.constant 7 : index
    %c0_32 = arith.constant 0 : index
    %c0_33 = arith.constant 0 : index
    %67 = vector.load %arg2[%c7, %c0_32, %c0_33] : memref<9x16x16xbf16, #tpu.memory_space<vmem>>, vector<1x16x16xbf16>
    %68 = vector.shape_cast %67 : vector<1x16x16xbf16> to vector<16x16xbf16>
    %cst_34 = arith.constant dense<0.000000e+00> : vector<16x324xf32>
    %69 = tpu.matmul %68, %66, %cst_34 {dimension_numbers = #tpu.dot_dimension_numbers<[1], [0], [0], [1], [0, 0, 1, 1], [], []>} : vector<16x16xbf16>, vector<16x324xbf16>, vector<16x324xf32> -> vector<16x324xf32>
    %70 = arith.addf %63, %69 : vector<16x324xf32>
    %71 = vector.extract_strided_slice %18 {offsets = [0, 19], sizes = [16, 305], strides = [1, 1]} : vector<16x324xbf16> to vector<16x305xbf16>
    %72 = vector.extract_strided_slice %18 {offsets = [0, 0], sizes = [16, 19], strides = [1, 1]} : vector<16x324xbf16> to vector<16x19xbf16>
    %73 = tpu.concatenate %71, %72 in 1 : vector<16x305xbf16>, vector<16x19xbf16> -> vector<16x324xbf16>
    %c8 = arith.constant 8 : index
    %c0_35 = arith.constant 0 : index
    %c0_36 = arith.constant 0 : index
    %74 = vector.load %arg2[%c8, %c0_35, %c0_36] : memref<9x16x16xbf16, #tpu.memory_space<vmem>>, vector<1x16x16xbf16>
    %75 = vector.shape_cast %74 : vector<1x16x16xbf16> to vector<16x16xbf16>
    %cst_37 = arith.constant dense<0.000000e+00> : vector<16x324xf32>
    %76 = tpu.matmul %75, %73, %cst_37 {dimension_numbers = #tpu.dot_dimension_numbers<[1], [0], [0], [1], [0, 0, 1, 1], [], []>} : vector<16x16xbf16>, vector<16x324xbf16>, vector<16x324xf32> -> vector<16x324xf32>
    %77 = arith.addf %70, %76 : vector<16x324xf32>
    %78 = vector.broadcast %0 : vector<1x324xf32> to vector<16x324xf32>
    %79 = arith.mulf %77, %78 : vector<16x324xf32>
    %cst_38 = arith.constant dense<0.000000e+00> : vector<16xf32>
    %80 = vector.multi_reduction <add>, %79, %cst_38 [1] : vector<16x324xf32> to vector<16xf32>
    %81 = vector.shape_cast %80 : vector<16xf32> to vector<16x1xf32>
    %cst_39 = arith.constant 3.906250e-03 : f32
    %82 = vector.broadcast %cst_39 : f32 to vector<16x1xf32>
    %83 = arith.mulf %81, %82 : vector<16x1xf32>
    %84 = vector.broadcast %83 : vector<16x1xf32> to vector<16x324xf32>
    %85 = arith.subf %77, %84 : vector<16x324xf32>
    %86 = vector.broadcast %0 : vector<1x324xf32> to vector<16x324xf32>
    %87 = arith.mulf %85, %86 : vector<16x324xf32>
    %88 = arith.mulf %87, %87 : vector<16x324xf32>
    %cst_40 = arith.constant dense<0.000000e+00> : vector<16xf32>
    %89 = vector.multi_reduction <add>, %88, %cst_40 [1] : vector<16x324xf32> to vector<16xf32>
    %90 = vector.shape_cast %89 : vector<16xf32> to vector<16x1xf32>
    %91 = arith.truncf %77 : vector<16x324xf32> to vector<16x324xbf16>
    %c0_41 = arith.constant 0 : index
    %c0_42 = arith.constant 0 : index
    %c0_43 = arith.constant 0 : index
    %92 = vector.load %arg6[%c0_41, %c0_42, %c0_43] : memref<1x16x324xbf16, #tpu.memory_space<vmem>>, vector<1x16x324xbf16>
    %93 = vector.shape_cast %92 : vector<1x16x324xbf16> to vector<16x324xbf16>
    %94 = vector.shape_cast %91 : vector<16x324xbf16> to vector<1x16x324xbf16>
    tpu.vector_store %arg6[%c0_41, %c0_42, %c0_43], %94 {strides = array<i32>} : memref<1x16x324xbf16, #tpu.memory_space<vmem>>, vector<1x16x324xbf16>,
    %95 = tpu.concatenate %83, %90 in 1 : vector<16x1xf32>, vector<16x1xf32> -> vector<16x2xf32>
    %c0_44 = arith.constant 0 : index
    %c0_45 = arith.constant 0 : index
    %c0_46 = arith.constant 0 : index
    %96 = vector.load %arg7[%c0_44, %c0_45, %c0_46] : memref<1x16x2xf32, #tpu.memory_space<vmem>>, vector<1x16x2xf32>
    %97 = vector.shape_cast %96 : vector<1x16x2xf32> to vector<16x2xf32>
    %98 = vector.shape_cast %95 : vector<16x2xf32> to vector<1x16x2xf32>
    tpu.vector_store %arg7[%c0_44, %c0_45, %c0_46], %98 {strides = array<i32>} : memref<1x16x2xf32, #tpu.memory_space<vmem>>, vector<1x16x2xf32>,
    return
  }
  func.func @transform_0(%arg0: i32) -> (i32, i32, i32) {
    %c0_i32 = arith.constant 0 : i32
    %c0_i32_0 = arith.constant 0 : i32
    %c0_i32_1 = arith.constant 0 : i32
    return %arg0, %c0_i32, %c0_i32_0 : i32, i32, i32
  }
  func.func @transform_1(%arg0: i32) -> (i32, i32, i32) {
    %c0_i32 = arith.constant 0 : i32
    %c0_i32_0 = arith.constant 0 : i32
    %c0_i32_1 = arith.constant 0 : i32
    %c0_i32_2 = arith.constant 0 : i32
    return %c0_i32, %c0_i32_0, %c0_i32_1 : i32, i32, i32
  }
  func.func @transform_2(%arg0: i32) -> (i32, i32) {
    %c0_i32 = arith.constant 0 : i32
    %c0_i32_0 = arith.constant 0 : i32
    %c0_i32_1 = arith.constant 0 : i32
    return %c0_i32, %c0_i32_0 : i32, i32
  }
  func.func @transform_3(%arg0: i32) -> (i32, i32) {
    %c0_i32 = arith.constant 0 : i32
    %c0_i32_0 = arith.constant 0 : i32
    %c0_i32_1 = arith.constant 0 : i32
    return %c0_i32, %c0_i32_0 : i32, i32
  }
  func.func @transform_4(%arg0: i32) -> (i32, i32) {
    %c0_i32 = arith.constant 0 : i32
    %c0_i32_0 = arith.constant 0 : i32
    %c0_i32_1 = arith.constant 0 : i32
    return %c0_i32, %c0_i32_0 : i32, i32
  }
  func.func @transform_5(%arg0: i32) -> (i32, i32, i32) {
    %c0_i32 = arith.constant 0 : i32
    %c0_i32_0 = arith.constant 0 : i32
    %c0_i32_1 = arith.constant 0 : i32
    return %arg0, %c0_i32, %c0_i32_0 : i32, i32, i32
  }
  func.func @transform_6(%arg0: i32) -> (i32, i32, i32) {
    %c0_i32 = arith.constant 0 : i32
    %c0_i32_0 = arith.constant 0 : i32
    %c0_i32_1 = arith.constant 0 : i32
    return %arg0, %c0_i32, %c0_i32_0 : i32, i32, i32
  }
}

module attributes {stable_mosaic.version = 11 : i64} {
  func.func @_bn_relu_kernel(%arg0: i32, %arg1: memref<1x16x324xbf16, #tpu.memory_space<vmem>>, %arg2: memref<16x1xf32, #tpu.memory_space<vmem>>, %arg3: memref<16x1xf32, #tpu.memory_space<vmem>>, %arg4: memref<1x16x324xf32, #tpu.memory_space<vmem>>) attributes {dimension_semantics = [#tpu.dimension_semantics<parallel>], iteration_bounds = array<i64: 2>, scalar_prefetch = 0 : i64, scratch_operands = 0 : i64, tpu.core_type = #tpu.core_type<tc>, window_params = [{transform_indices = @transform_0, window_bounds = array<i64: 1, 16, 324>}, {pipeline_mode = #tpu.pipeline_mode<synchronous>, transform_indices = @transform_1, window_bounds = array<i64: 16, 1>}, {pipeline_mode = #tpu.pipeline_mode<synchronous>, transform_indices = @transform_2, window_bounds = array<i64: 16, 1>}, {transform_indices = @transform_3, window_bounds = array<i64: 1, 16, 324>}]} {
    %c0 = arith.constant 0 : index
    %c0_0 = arith.constant 0 : index
    %c0_1 = arith.constant 0 : index
    %0 = vector.load %arg1[%c0, %c0_0, %c0_1] : memref<1x16x324xbf16, #tpu.memory_space<vmem>>, vector<1x16x324xbf16>
    %1 = vector.shape_cast %0 : vector<1x16x324xbf16> to vector<16x324xbf16>
    %2 = arith.extf %1 : vector<16x324xbf16> to vector<16x324xf32>
    %c0_2 = arith.constant 0 : index
    %c0_3 = arith.constant 0 : index
    %3 = vector.load %arg2[%c0_2, %c0_3] : memref<16x1xf32, #tpu.memory_space<vmem>>, vector<16x1xf32>
    %4 = vector.broadcast %3 : vector<16x1xf32> to vector<16x324xf32>
    %5 = arith.mulf %2, %4 : vector<16x324xf32>
    %c0_4 = arith.constant 0 : index
    %c0_5 = arith.constant 0 : index
    %6 = vector.load %arg3[%c0_4, %c0_5] : memref<16x1xf32, #tpu.memory_space<vmem>>, vector<16x1xf32>
    %7 = vector.broadcast %6 : vector<16x1xf32> to vector<16x324xf32>
    %8 = arith.addf %5, %7 : vector<16x324xf32>
    %cst = arith.constant 0.000000e+00 : f32
    %9 = vector.broadcast %cst : f32 to vector<16x324xf32>
    %10 = arith.maximumf %8, %9 : vector<16x324xf32>
    %c0_6 = arith.constant 0 : index
    %c0_7 = arith.constant 0 : index
    %c0_8 = arith.constant 0 : index
    %11 = vector.load %arg4[%c0_6, %c0_7, %c0_8] : memref<1x16x324xf32, #tpu.memory_space<vmem>>, vector<1x16x324xf32>
    %12 = vector.shape_cast %11 : vector<1x16x324xf32> to vector<16x324xf32>
    %13 = vector.shape_cast %10 : vector<16x324xf32> to vector<1x16x324xf32>
    tpu.vector_store %arg4[%c0_6, %c0_7, %c0_8], %13 {strides = array<i32>} : memref<1x16x324xf32, #tpu.memory_space<vmem>>, vector<1x16x324xf32>,
    return
  }
  func.func @transform_0(%arg0: i32) -> (i32, i32, i32) {
    %c0_i32 = arith.constant 0 : i32
    %c0_i32_0 = arith.constant 0 : i32
    %c0_i32_1 = arith.constant 0 : i32
    return %arg0, %c0_i32, %c0_i32_0 : i32, i32, i32
  }
  func.func @transform_1(%arg0: i32) -> (i32, i32) {
    %c0_i32 = arith.constant 0 : i32
    %c0_i32_0 = arith.constant 0 : i32
    %c0_i32_1 = arith.constant 0 : i32
    return %c0_i32, %c0_i32_0 : i32, i32
  }
  func.func @transform_2(%arg0: i32) -> (i32, i32) {
    %c0_i32 = arith.constant 0 : i32
    %c0_i32_0 = arith.constant 0 : i32
    %c0_i32_1 = arith.constant 0 : i32
    return %c0_i32, %c0_i32_0 : i32, i32
  }
  func.func @transform_3(%arg0: i32) -> (i32, i32, i32) {
    %c0_i32 = arith.constant 0 : i32
    %c0_i32_0 = arith.constant 0 : i32
    %c0_i32_1 = arith.constant 0 : i32
    return %arg0, %c0_i32, %c0_i32_0 : i32, i32, i32
  }
}

</mosaic_0001>

<bundles_post_ra>
// kernel: up_block_forward.5
= control target key start
LH: loop header
LB: loop body
LE: loop exit
PB: predicated region body
PF: predicated region fallthrough
CT: control target
= control target key end

     0   :  { %s336_s12 = smov 0   ;;  %s367_s0 = inlined_call_operand.vmem [shape: bf16[2,16,324], index: 0, kind: input, shape index: {}]   ;;  %s368_s1 = inlined_call_operand.vmem [shape: f32[16,1], index: 1, kind: input, shape index: {}]   ;;  %s369_s2 = inlined_call_operand.vmem [shape: f32[16,1], index: 2, kind: input, shape index: {}]   ;;  %s370_s3 = inlined_call_operand.vmem [shape: f32[2,16,324], index: 3, kind: output, shape index: {}]  }
   0x1 LB: > { %s285_s13 = sadd.s32 4294967295, %s313_s12   ;;  %p289_p0 = scmp.ge.s32.totalorder %s313_s12, 1  ;;  %s313_s12 = sphi %s336_s12, %s13_s12  }
   0x2   : > { %p137_p1 = scmp.lt.s32.totalorder %s313_s12, 3 }
   0x4   : > { %p138_p2 = pnand %p289_p0, %p137_p1 }
   0x5   : > { %v199_v0 = vld [vmem:[%s369_s2] sm:$0xff] (!%p138_p2)  ;;  %v315_v2 = vmov (!%p138_p2), 0   ;;  %v200_v3 = vld [vmem:[%s369_s2 + $0x8] sm:$0xff] (!%p138_p2)  ;;  %p161_p3 = scmp.lt.s32.totalorder (!%p138_p2), %s285_s13, 1  ;;  %vm225_vm0 = vcmask (!%p138_p2), 556032  }
   0x6   : > { %141 = sbr.rel (%p138_p2) target bundleno = 147 (0x93), region = 32  ;;  %v181_v1 = vld [vmem:[%s368_s1] sm:$0xff] (!%p138_p2)  ;;  %306 = vset.pattern.permute.xlu1 (!%p138_p2), %v315_v2  ;;  %305 = vset.pattern.permute.xlu0 (!%p138_p2), %v315_v2  ;;  %v182_v4 = vld [vmem:[%s368_s1 + $0x8] sm:$0xff] (!%p138_p2) }
   0x7   : > { %203 = vperm.xlu1 (!%p138_p2), %306, %v199_v0   ;;  %185 = vperm.xlu0 (!%p138_p2), %305, %v181_v1  }
   0xb   : > { %208 = vperm.xlu1 (!%p138_p2), %306, %v200_v3   ;;  %190 = vperm.xlu0 (!%p138_p2), %305, %v182_v4  }
   0xd   : > { %s372_s13 = smov (!%p161_p3, %s285_s13), 1 }
   0xe   : > { %s294_s22 = smul.u32 24, %s372_s13 }
   0xf   : > { %s295_s26 = smul.u32 48, %s372_s13 }
  0x10   : > { %s165_s25 = scalar_lea.vmem %s367_s0, %s294_s22 }
  0x11   : > { %v171_v5 = vld [vmem:[%s165_s25] sm:$0xff]  ;;  %v172_v6 = vld [vmem:[%s165_s25 + $0x8] ss:$12 sps:$4 sm:$0xff]   ;;  %v173_v10 = vld [vmem:[%s165_s25 + $0xc] sm:$0xff]  ;;  %s170_s29 = scalar_lea.vmem %s370_s3, %s295_s26 }
  0x12   : > { %v175_v7 = vunpack.c.l.bf16 %v171_v5  ;;  %v176_v8 = vunpack.c.h.bf16 %v171_v5  ;;  %v177_v9 = vunpack.c.l.bf16 %v172_v6  ;;  %v178_v16 = vunpack.c.l.bf16 %v173_v10 }
  0x13   : > { %v179_v17 = vunpack.c.h.bf16 %v173_v10  ;;  %v180_v18 = vunpack.c.h.bf16 %v172_v6 }
  0x86   : > { %v204_v11 = vpop.permute.xlu1 %203  ;;  %v186_v12 = vpop.permute.xlu0 %185 }
  0x87   : > { %v193_v13 = vmul.f32 %v186_v12, %v175_v7  ;;  %v194_v14 = vmul.f32 %v186_v12, %v176_v8  ;;  %v195_v15 = vmul.f32 %v186_v12, %v177_v9 }
  0x89   : > { %v211_v19 = vadd.f32 %v204_v11, %v193_v13  ;;  %v212_v20 = vadd.f32 %v204_v11, %v194_v14  ;;  %v213_v21 = vadd.f32 %v204_v11, %v195_v15 }
  0x8a   : > { %v191_v22 = vpop.permute.xlu0 %190  ;;  %v209_v27 = vpop.permute.xlu1 %208 }
  0x8b   : > { %v217_v23 = vmax.f32 %v211_v19, 0.0  ;;  %v218_v24 = vmax.f32 %v212_v20, 0.0  ;;  %v219_v25 = vmax.f32 %v213_v21, 0.0  ;;  %v196_v26 = vmul.f32 %v191_v22, %v178_v16 }
  0x8c   : > { %v197_v28 = vmul.f32 %v191_v22, %v179_v17  ;;  %v198_v29 = vmul.f32 %v191_v22, %v180_v18 }
  0x8d   : > { %223 = vst [vmem:[%s170_s29] sm:$0xff] %v217_v23  ;;  %224 = vst [vmem:[%s170_s29 + $0x8] sm:$0xff] %v218_v24  ;;  %v214_v30 = vadd.f32 %v209_v27, %v196_v26 }
  0x8e   : > { %226 = vst.msk [vmem:[%s170_s29 + $0x10] sm:$0xff] %vm225_vm0, %v219_v25  ;;  %v215_v31 = vadd.f32 %v209_v27, %v197_v28  ;;  %v216_v32 = vadd.f32 %v209_v27, %v198_v29 }
  0x8f   : > { %v220_v33 = vmax.f32 %v214_v30, 0.0 }
  0x90   : > { %v221_v34 = vmax.f32 %v215_v31, 0.0  ;;  %v222_v35 = vmax.f32 %v216_v32, 0.0 }
  0x91   : > { %227 = vst [vmem:[%s170_s29 + $0x18] sm:$0xff] %v220_v33 }
  0x92   : > { %228 = vst [vmem:[%s170_s29 + $0x20] sm:$0xff] %v221_v34  ;;  %229 = vst.msk [vmem:[%s170_s29 + $0x28] sm:$0xff] %vm225_vm0, %v222_v35 }
  0x93 PF: > { %s13_s12 = sadd.s32 1, %s313_s12  }
  0x94   : > { %p10_p4 = scmp.ge.s32.totalorder %s13_s12, 4  }
  0x96   :  { %12 = sbr.rel (!%p10_p4) target bundleno = 1 (0x1), region = 62 }

// kernel: up_block_forward.3
= control target key start
LH: loop header
LB: loop body
LE: loop exit
PB: predicated region body
PF: predicated region fallthrough
CT: control target
= control target key end

     0   :  { %s1806_s15 = smov 0   ;;  %s2005_s0 = inlined_call_operand.vmem [shape: bf16[2,12,324], index: 0, kind: input, shape index: {}]   ;;  %s2006_s1 = inlined_call_operand.vmem [shape: bf16[9,16,12], index: 1, kind: input, shape index: {}]   ;;  %s2007_s2 = inlined_call_operand.vmem [shape: f32[1,324], index: 2, kind: input, shape index: {}]   ;;  %s2008_s3 = inlined_call_operand.vmem [shape: bf16[2,16,324], index: 3, kind: output, shape index: {0}]   ;;  %s2009_s4 = inlined_call_operand.vmem [shape: f32[2,16,2], index: 4, kind: output, shape index: {1}]  }
   0x1 LB: > { %s1502_s16 = sadd.s32 4294967295, %s1760_s15   ;;  %p1506_p0 = scmp.ge.s32.totalorder %s1760_s15, 1  ;;  %s1760_s15 = sphi %s1806_s15, %s15_s15  }
   0x2   : > { %p165_p1 = scmp.lt.s32.totalorder %s1760_s15, 3 }
   0x4   : > { %p166_p2 = pnand %p1506_p0, %p165_p1 }
   0x5   : > { %p196_p3 = scmp.lt.s32.totalorder (!%p166_p2), %s1502_s16, 1  ;;  %v1762_v0 = vmov (!%p166_p2), 0.0   ;;  %v1763_v1 = vmov (!%p166_p2), 0   ;;  %vm1764_vm0 = vmmov (!%p166_p2), 0   ;;  %s1765_s21 = smov (!%p166_p2), 78   ;;  %vm254_vm1 = vcmask (!%p166_p2), 146432  }
   0x6   : > { %169 = sbr.rel (%p166_p2) target bundleno = 760 (0x2f8), region = 32  ;;  %1595 = vmatprep.subr.bf16.mxu1 (!%p166_p2), %v1762_v0  ;;  %314 = vmatprep.mubr.bf16.mxu0 (!%p166_p2), %v1763_v1  ;;  %s1766_s22 = smov (!%p166_p2), 18   ;;  %vm273_vm2 = vcmask (!%p166_p2), 1045504   ;;  %v1745_v13 = vld [vmem:[%s2006_s1 + $0x8] sm:$0xff] (!%p166_p2)   ;;  %vm237_vm3 = vcmask (!%p166_p2), 154624   ;;  %vm269_vm4 = vcmask (!%p166_p2), 97280  }
   0x7   : > { %1597 = vmatprep.mubr.msk.bf16.mxu1 (!%p166_p2), %vm1764_vm0, %v1762_v0  ;;  %s1767_s23 = smov (!%p166_p2), 79   ;;  %s1768_s24 = smov (!%p166_p2), 19   ;;  %vm474_vm5 = vcmask (!%p166_p2), 138240   ;;  %v1746_v27 = vld [vmem:[%s2006_s1] sm:$0xff] (!%p166_p2)   ;;  %vm598_vm6 = vcmask (!%p166_p2), 7168   ;;  %v1747_v40 = vld [vmem:[%s2006_s1 + $0x10] sm:$0xff] (!%p166_p2)  }
   0x8   : > { %s1769_s25 = smov (!%p166_p2), 77   ;;  %s1770_s26 = smov (!%p166_p2), 17   ;;  %v1748_v45 = vld [vmem:[%s2006_s1 + $0x18] sm:$0xff] (!%p166_p2)   ;;  %vm830_vm7 = vcmask (!%p166_p2), 1039360   ;;  %vm835_vm8 = vcmask (!%p166_p2), 547840   ;;  %v1749_v54 = vld [vmem:[%s2006_s1 + $0x20] sm:$0xff] (!%p166_p2)  }
   0x9   : > { %s1771_s27 = smov (!%p166_p2), 61   ;;  %s1772_s28 = smov (!%p166_p2), 1   ;;  %vm954_vm9 = vcmask (!%p166_p2), 908288   ;;  %vm959_vm10 = vcmask (!%p166_p2), 416768   ;;  %vm1078_vm11 = vcmask (!%p166_p2), 900096   ;;  %vm1083_vm12 = vcmask (!%p166_p2), 408576  }
   0xa   : > { %s1773_s29 = smov (!%p166_p2), 127   ;;  %s1774_s30 = smov (!%p166_p2), 67   ;;  %vm1202_vm13 = vcmask (!%p166_p2), 891904   ;;  %vm1207_vm14 = vcmask (!%p166_p2), 400384   ;;  %vm1405_vm15 = vcmask (!%p166_p2), 551936  }
   0xb   : > { %s1775_s5 = smov (!%p166_p2), 111   ;;  %s1776_s6 = smov (!%p166_p2), 51  }
   0xc   : > { %s1777_s7 = smov (!%p166_p2), 110   ;;  %s1778_s8 = smov (!%p166_p2), 50  }
   0xd   : > { %s2011_s16 = smov (!%p196_p3, %s1502_s16), 1  ;;  %s1779_s9 = smov 109  }
   0xe   : > { %s1713_s17 = smul.u32 24, %s2011_s16  ;;  %s1780_s10 = smov 49  }
  0x10   : > { %s200_s20 = scalar_lea.vmem %s2005_s0, %s1713_s17 }
  0x11   : > { %v1826_v2 = vld [vmem:[%s200_s20 + $0x8] ss:$12 sps:$4 sm:$0x3f]   ;;  %v1828_v3 = vld [vmem:[%s200_s20 + $0x4] ss:$12 sps:$4 sm:$0x3f]  }
  0x12   : > { %v1830_v4 = vld [vmem:[%s200_s20] ss:$12 sps:$4 sm:$0x3f]   ;;  %246 = vrot.lane.b32.xlu0 %v1826_v2, %s1765_s21  ;;  %250 = vrot.lane.b32.xlu1 %v1828_v3, %s1766_s22  ;;  %v732_v49 = vsel %vm273_vm2, %v1826_v2, 0 }
  0x13   : > { %v726_v48 = vsel %vm273_vm2, %v1830_v4, 0 }
  0x16   : > { %248 = vrot.lane.b32.xlu0 %v1830_v4, %s1766_s22  ;;  %252 = vrot.lane.b32.xlu1 %v1826_v2, %s1766_s22 }
  0x1a   : > { %221 = vrot.lane.b32.xlu0 %v1826_v2, %s1767_s23  ;;  %231 = vrot.lane.b32.xlu1 %v1830_v4, %s1768_s24 }
  0x1e   : > { %233 = vrot.lane.b32.xlu0 %v1828_v3, %s1768_s24  ;;  %235 = vrot.lane.b32.xlu1 %v1826_v2, %s1768_s24 }
  0x22   : > { %466 = vrot.lane.b32.xlu0 %v1826_v2, %s1769_s25  ;;  %468 = vrot.lane.b32.xlu1 %v1830_v4, %s1770_s26 }
  0x26   : > { %470 = vrot.lane.b32.xlu0 %v1828_v3, %s1770_s26  ;;  %472 = vrot.lane.b32.xlu1 %v1826_v2, %s1770_s26 }
  0x2a   : > { %590 = vrot.lane.b32.xlu0 %v1826_v2, %s1771_s27  ;;  %592 = vrot.lane.b32.xlu1 %v1830_v4, %s1772_s28 }
  0x2e   : > { %594 = vrot.lane.b32.xlu0 %v1828_v3, %s1772_s28  ;;  %596 = vrot.lane.b32.xlu1 %v1826_v2, %s1772_s28 }
  0x32   : > { %824 = vrot.lane.b32.xlu0 %v1830_v4, %s1773_s29  ;;  %826 = vrot.lane.b32.xlu1 %v1828_v3, %s1773_s29 }
  0x36   : > { %828 = vrot.lane.b32.xlu0 %v1826_v2, %s1773_s29  ;;  %833 = vrot.lane.b32.xlu1 %v1830_v4, %s1774_s30 }
  0x3a   : > { %948 = vrot.lane.b32.xlu0 %v1830_v4, %s1775_s5  ;;  %950 = vrot.lane.b32.xlu1 %v1828_v3, %s1775_s5 }
  0x3e   : > { %952 = vrot.lane.b32.xlu0 %v1826_v2, %s1775_s5  ;;  %957 = vrot.lane.b32.xlu1 %v1830_v4, %s1776_s6 }
  0x42   : > { %1072 = vrot.lane.b32.xlu0 %v1830_v4, %s1777_s7  ;;  %1074 = vrot.lane.b32.xlu1 %v1828_v3, %s1777_s7 }
  0x46   : > { %1076 = vrot.lane.b32.xlu0 %v1826_v2, %s1777_s7  ;;  %1081 = vrot.lane.b32.xlu1 %v1830_v4, %s1778_s8 }
  0x4a   : > { %1196 = vrot.lane.b32.xlu0 %v1830_v4, %s1779_s9  ;;  %1198 = vrot.lane.b32.xlu1 %v1828_v3, %s1779_s9 }
  0x4e   : > { %1200 = vrot.lane.b32.xlu0 %v1826_v2, %s1779_s9  ;;  %1205 = vrot.lane.b32.xlu1 %v1830_v4, %s1780_s10  ;;  %v1750_v2 = vld [vmem:[%s2006_s1 + $0x28] sm:$0xff]   ;;  %s205_s10 = scalar_lea.vmem %s2008_s3, %s1713_s17  ;;  %s1572_s17 = sshll.u32 %s2011_s16, 4 }
  0x4f   : > { %s210_s13 = scalar_lea.vmem %s2009_s4, %s1572_s17 }
  0x84   : > { %v247_v5 = vpop.permute.xlu0 %246  ;;  %v251_v6 = vpop.permute.xlu1 %250 }
  0x88   : > { %v249_v7 = vpop.permute.xlu0 %248  ;;  %v253_v8 = vpop.permute.xlu1 %252 }
  0x89   : > { %v255_v9 = vsel %vm254_vm1, %v249_v7, %v251_v6  ;;  %v260_v10 = vsel %vm254_vm1, %v247_v5, %v249_v7  ;;  %v256_v12 = vsel %vm254_vm1, %v251_v6, %v253_v8  ;;  %vm1411_vm1 = vcmask 15360  }
  0x8a   : > { %1517 = vmatprep.subr.msk.bf16.mxu0 %vm273_vm2, %v255_v9  ;;  %v274_v11 = vsel %vm273_vm2, %v260_v10, 0  ;;  %v280_v14 = vsel %vm273_vm2, %v256_v12, 0  ;;  %v1751_v12 = vld [vmem:[%s2006_s1 + $0x30] sm:$0xff]  }
  0x8b   : > { %283 = vmatpush1.bf16.msra.mxu0 %v274_v11  ;;  %1596 = vmatpush3.bf16.msra.mxu1 %v280_v14 }
  0x8c   : > { %v222_v15 = vpop.permute.xlu0 %221  ;;  %v232_v16 = vpop.permute.xlu1 %231  ;;  %1601 = vmatprep.subr.bf16.mxu1 %v1762_v0 }
  0x8d   : > { %v243_v17 = vsel %vm237_vm3, %v222_v15, %v232_v16 }
  0x8e   : > { %1518 = vmatmul.mubr.msk.bf16.vlgmr.msra.gmra.mrb[0].mxu0 %vm269_vm4, %v1745_v13  ;;  %1598 = vmatmul.mubr.msk.bf16.vlgmr.msra.gmra.mrb[0].mxu1 %vm269_vm4, %v1745_v13  ;;  %v374_v18 = vsel %vm273_vm2, %v243_v17, 0 }
  0x8f   : > { %414 = vmatprep.mubr.bf16.mxu0 %v1763_v1  ;;  %1603 = vmatprep.mubr.msk.bf16.mxu1 %vm1764_vm0, %v1762_v0 }
  0x90   : > { %v234_v19 = vpop.permute.xlu0 %233  ;;  %v236_v20 = vpop.permute.xlu1 %235 }
  0x91   : > { %v238_v21 = vsel %vm237_vm3, %v232_v16, %v234_v19  ;;  %v239_v22 = vsel %vm237_vm3, %v234_v19, %v236_v20 }
  0x92   : > { %1521 = vmatprep.subr.msk.bf16.mxu0 %vm273_vm2, %v238_v21  ;;  %v380_v23 = vsel %vm273_vm2, %v239_v22, 0  ;;  %v1752_v21 = vld [vmem:[%s2006_s1 + $0x38] sm:$0xff]  }
  0x93   : > { %383 = vmatpush1.bf16.msra.mxu0 %v374_v18  ;;  %1602 = vmatpush3.bf16.msra.mxu1 %v380_v23 }
  0x94   : > { %v467_v24 = vpop.permute.xlu0 %466  ;;  %v469_v25 = vpop.permute.xlu1 %468  ;;  %1607 = vmatprep.subr.bf16.mxu1 %v1762_v0 }
  0x95   : > { %v480_v26 = vsel %vm474_vm5, %v467_v24, %v469_v25 }
  0x96   : > { %v492_v28 = vsel %vm273_vm2, %v480_v26, 0  ;;  %v1322_v26 = vlaneseq }
  0x98   : > { %v471_v29 = vpop.permute.xlu0 %470  ;;  %v473_v31 = vpop.permute.xlu1 %472 }
  0x99   : > { %v475_v30 = vsel %vm474_vm5, %v469_v25, %v471_v29  ;;  %v476_v32 = vsel %vm474_vm5, %v471_v29, %v473_v31  ;;  %v1753_v25 = vld [vmem:[%s2006_s1 + $0x40] sm:$0xff]  }
  0x9a   : > { %1522 = vmatmul.mubr.msk.bf16.vlgmr.msra.gmra.mrb[0].mxu0 %vm269_vm4, %v1746_v27  ;;  %1527 = vmatprep.subr.msk.bf16.mxu0 %vm273_vm2, %v475_v30  ;;  %v498_v33 = vsel %vm273_vm2, %v476_v32, 0  ;;  %v1320_v29 = vld [vmem:[%s2007_s2] sm:$0x7] }
  0x9b   : > { %1604 = vmatmul.mubr.msk.bf16.vlgmr.msra.gmra.mrb[0].mxu1 %vm269_vm4, %v1746_v27  ;;  %501 = vmatpush1.bf16.msra.mxu0 %v492_v28  ;;  %v1323_v27 = vshrl.u32 %v1322_v26, 7 }
  0x9c   : > { %1608 = vmatpush3.bf16.msra.mxu1 %v498_v33  ;;  %v591_v34 = vpop.permute.xlu0 %590  ;;  %532 = vmatprep.mubr.bf16.mxu0 %v1763_v1  ;;  %v593_v35 = vpop.permute.xlu1 %592 }
  0x9d   : > { %1609 = vmatprep.mubr.msk.bf16.mxu1 %vm1764_vm0, %v1762_v0  ;;  %1613 = vmatprep.subr.bf16.mxu1 %v1762_v0  ;;  %v604_v37 = vsel %vm598_vm6, %v591_v34, %v593_v35  ;;  %v1324_v28 = vsub.s32 0, %v1323_v27  ;;  %v1328_v30 = vsub.s32 1, %v1323_v27 }
  0x9e   : > { %v616_v42 = vsel %vm273_vm2, %v604_v37, 0 }
  0x9f   : > { %v1325_v31 = vrot.slane %v1320_v29, %v1324_v28  ;;  %v1329_v32 = vrot.slane %v1320_v29, %v1328_v30 }
  0xa0   : > { %v595_v36 = vpop.permute.xlu0 %594  ;;  %v597_v39 = vpop.permute.xlu1 %596 }
  0xa1   : > { %v599_v38 = vsel %vm598_vm6, %v593_v35, %v595_v36  ;;  %v600_v41 = vsel %vm598_vm6, %v595_v36, %v597_v39 }
  0xa2   : > { %1533 = vmatprep.subr.msk.bf16.mxu0 %vm273_vm2, %v599_v38  ;;  %v622_v43 = vsel %vm273_vm2, %v600_v41, 0 }
  0xa4   : > { %v825_v44 = vpop.permute.xlu0 %824  ;;  %v827_v46 = vpop.permute.xlu1 %826 }
  0xa5   : > { %v831_v53 = vsel %vm830_vm7, %v825_v44, %v827_v46 }
  0xa6   : > { %1528 = vmatmul.mubr.msk.bf16.vlgmr.msra.gmra.mrb[0].mxu0 %vm269_vm4, %v1747_v40  ;;  %v851_v58 = vsel %vm273_vm2, %v831_v53, 0 }
  0xa7   : > { %1610 = vmatmul.mubr.msk.bf16.vlgmr.msra.gmra.mrb[0].mxu1 %vm269_vm4, %v1747_v40  ;;  %625 = vmatpush1.bf16.msra.mxu0 %v616_v42 }
  0xa8   : > { %1614 = vmatpush3.bf16.msra.mxu1 %v622_v43  ;;  %656 = vmatprep.mubr.bf16.mxu0 %v1763_v1  ;;  %v829_v47 = vpop.permute.xlu0 %828  ;;  %v834_v52 = vpop.permute.xlu1 %833 }
  0xa9   : > { %1615 = vmatprep.mubr.msk.bf16.mxu1 %vm1764_vm0, %v1762_v0  ;;  %1539 = vmatprep.subr.msk.bf16.mxu0 %vm273_vm2, %v1828_v3  ;;  %v832_v50 = vsel %vm830_vm7, %v827_v46, %v829_v47  ;;  %v838_v55 = vsel %vm835_vm8, %v829_v47, %v834_v52 }
  0xaa   : > { %1619 = vmatprep.subr.bf16.mxu1 %v1762_v0  ;;  %v856_v59 = vsel %vm273_vm2, %v838_v55, 0 }
  0xac   : > { %v949_v51 = vpop.permute.xlu0 %948  ;;  %v951_v56 = vpop.permute.xlu1 %950 }
  0xad   : > { %v955_v63 = vsel %vm954_vm9, %v949_v51, %v951_v56 }
  0xae   : > { %v975_v6 = vsel %vm273_vm2, %v955_v63, 0 }
  0xb0   : > { %v953_v57 = vpop.permute.xlu0 %952  ;;  %v958_v62 = vpop.permute.xlu1 %957 }
  0xb1   : > { %v956_v60 = vsel %vm954_vm9, %v951_v56, %v953_v57  ;;  %v962_v3 = vsel %vm959_vm10, %v953_v57, %v958_v62 }
  0xb2   : > { %1534 = vmatmul.mubr.msk.bf16.vlgmr.msra.gmra.mrb[0].mxu0 %vm269_vm4, %v1748_v45  ;;  %v980_v7 = vsel %vm273_vm2, %v962_v3, 0 }
  0xb3   : > { %1616 = vmatmul.mubr.msk.bf16.vlgmr.msra.gmra.mrb[0].mxu1 %vm269_vm4, %v1748_v45  ;;  %735 = vmatpush1.bf16.msra.mxu0 %v726_v48 }
  0xb4   : > { %1620 = vmatpush3.bf16.msra.mxu1 %v732_v49  ;;  %766 = vmatprep.mubr.bf16.mxu0 %v1763_v1  ;;  %v1073_v61 = vpop.permute.xlu0 %1072  ;;  %v1075_v4 = vpop.permute.xlu1 %1074 }
  0xb5   : > { %1621 = vmatprep.mubr.msk.bf16.mxu1 %vm1764_vm0, %v1762_v0  ;;  %1545 = vmatprep.subr.msk.bf16.mxu0 %vm273_vm2, %v832_v50  ;;  %v1079_v11 = vsel %vm1078_vm11, %v1073_v61, %v1075_v4 }
  0xb6   : > { %1625 = vmatprep.subr.bf16.mxu1 %v1762_v0  ;;  %v1099_v16 = vsel %vm273_vm2, %v1079_v11, 0 }
  0xb8   : > { %v1077_v5 = vpop.permute.xlu0 %1076  ;;  %v1082_v10 = vpop.permute.xlu1 %1081 }
  0xb9   : > { %v1080_v8 = vsel %vm1078_vm11, %v1075_v4, %v1077_v5  ;;  %v1086_v13 = vsel %vm1083_vm12, %v1077_v5, %v1082_v10 }
  0xba   : > { %v1104_v17 = vsel %vm273_vm2, %v1086_v13, 0 }
  0xbc   : > { %v1197_v9 = vpop.permute.xlu0 %1196  ;;  %v1199_v14 = vpop.permute.xlu1 %1198 }
  0xbd   : > { %v1203_v20 = vsel %vm1202_vm13, %v1197_v9, %v1199_v14 }
  0xbe   : > { %1540 = vmatmul.mubr.msk.bf16.vlgmr.msra.gmra.mrb[0].mxu0 %vm269_vm4, %v1749_v54  ;;  %v1223_v23 = vsel %vm273_vm2, %v1203_v20, 0 }
  0xbf   : > { %1622 = vmatmul.mubr.msk.bf16.vlgmr.msra.gmra.mrb[0].mxu1 %vm269_vm4, %v1749_v54  ;;  %859 = vmatpush1.bf16.msra.mxu0 %v851_v58 }
  0xc0   : > { %1626 = vmatpush3.bf16.msra.mxu1 %v856_v59  ;;  %890 = vmatprep.mubr.bf16.mxu0 %v1763_v1  ;;  %v1201_v15 = vpop.permute.xlu0 %1200  ;;  %v1206_v19 = vpop.permute.xlu1 %1205 }
  0xc1   : > { %1627 = vmatprep.mubr.msk.bf16.mxu1 %vm1764_vm0, %v1762_v0  ;;  %1551 = vmatprep.subr.msk.bf16.mxu0 %vm273_vm2, %v956_v60  ;;  %v1204_v18 = vsel %vm1202_vm13, %v1199_v14, %v1201_v15  ;;  %v1210_v22 = vsel %vm1207_vm14, %v1201_v15, %v1206_v19 }
  0xc2   : > { %1631 = vmatprep.subr.bf16.mxu1 %v1762_v0  ;;  %v1228_v24 = vsel %vm273_vm2, %v1210_v22, 0 }
  0xca   : > { %1546 = vmatmul.mubr.msk.bf16.vlgmr.msra.gmra.mrb[0].mxu0 %vm269_vm4, %v1750_v2 }
  0xcb   : > { %1628 = vmatmul.mubr.msk.bf16.vlgmr.msra.gmra.mrb[0].mxu1 %vm269_vm4, %v1750_v2  ;;  %983 = vmatpush1.bf16.msra.mxu0 %v975_v6 }
  0xcc   : > { %1632 = vmatpush3.bf16.msra.mxu1 %v980_v7  ;;  %1014 = vmatprep.mubr.bf16.mxu0 %v1763_v1 }
  0xcd   : > { %1633 = vmatprep.mubr.msk.bf16.mxu1 %vm1764_vm0, %v1762_v0  ;;  %1557 = vmatprep.subr.msk.bf16.mxu0 %vm273_vm2, %v1080_v8 }
  0xce   : > { %1637 = vmatprep.subr.bf16.mxu1 %v1762_v0 }
  0xd6   : > { %1552 = vmatmul.mubr.msk.bf16.vlgmr.msra.gmra.mrb[0].mxu0 %vm269_vm4, %v1751_v12 }
  0xd7   : > { %1634 = vmatmul.mubr.msk.bf16.vlgmr.msra.gmra.mrb[0].mxu1 %vm269_vm4, %v1751_v12  ;;  %1107 = vmatpush1.bf16.msra.mxu0 %v1099_v16 }
  0xd8   : > { %1638 = vmatpush3.bf16.msra.mxu1 %v1104_v17  ;;  %1138 = vmatprep.mubr.bf16.mxu0 %v1763_v1 }
  0xd9   : > { %1639 = vmatprep.mubr.msk.bf16.mxu1 %vm1764_vm0, %v1762_v0  ;;  %1563 = vmatprep.subr.msk.bf16.mxu0 %vm273_vm2, %v1204_v18 }
  0xda   : > { %1643 = vmatprep.subr.bf16.mxu1 %v1762_v0 }
  0xe2   : > { %1558 = vmatmul.mubr.msk.bf16.vlgmr.msra.gmra.mrb[0].mxu0 %vm269_vm4, %v1752_v21 }
  0xe3   : > { %1640 = vmatmul.mubr.msk.bf16.vlgmr.msra.gmra.mrb[0].mxu1 %vm269_vm4, %v1752_v21  ;;  %1231 = vmatpush1.bf16.msra.mxu0 %v1223_v23 }
  0xe4   : > { %1644 = vmatpush3.bf16.msra.mxu1 %v1228_v24  ;;  %1262 = vmatprep.mubr.bf16.mxu0 %v1763_v1  ;;  %v1332_v1 = vsub.s32 2, %v1323_v27 }
  0xe5   : > { %1645 = vmatprep.mubr.msk.bf16.mxu1 %vm1764_vm0, %v1762_v0  ;;  %vm1344_vm0 = vcmask 556032  }
  0xe6   : > { %v1333_v0 = vrot.slane %v1320_v29, %v1332_v1 }
  0xee   : > { %1564 = vmatmul.mubr.msk.bf16.vlgmr.msra.gmra.mrb[0].mxu0 %vm269_vm4, %v1753_v25 }
  0xef   : > { %1646 = vmatmul.mubr.msk.bf16.vlgmr.msra.gmra.mrb[0].mxu1 %vm269_vm4, %v1753_v25 }
 0x1c1   : > { %v1264_v33 = vpop.f32.mrb[0].mxu0 }
 0x1c2   : > { %v1337_v34 = vmul.f32 %v1325_v31, %v1264_v33  ;;  %v1307_v35 = vpop.f32.mrb[0].mxu1  ;;  %v1266_v36 = vpop.f32.mrb[1].mxu0 }
 0x1c3   : > { %v1339_v37 = vmul.f32 %v1333_v0, %v1307_v35  ;;  %v1574_v38 = vpack.c.bf16 %v1307_v35, %v1307_v35  ;;  %v1338_v39 = vmul.f32 %v1329_v32, %v1266_v36  ;;  %v1573_v40 = vpack.c.bf16 %v1266_v36, %v1264_v33  ;;  %v1647_v41 = vpop.f32.mrb[1].mxu1  ;;  %v1268_v42 = vpop.f32.mrb[2].mxu0 }
 0x1c4   : > { %v1340_v43 = vmul.f32 %v1325_v31, %v1268_v42  ;;  %v1310_v44 = vpop.f32.mrb[2].mxu1  ;;  %v1270_v45 = vpop.f32.mrb[3].mxu0 }
 0x1c5   : > { %1404 = vst [vmem:[%s205_s10] sm:$0xff] %v1573_v40  ;;  %1406 = vst.msk [vmem:[%s205_s10 + $0x8] sm:$0xf] %vm1405_vm15, %v1574_v38  ;;  %v1342_v46 = vmul.f32 %v1333_v0, %v1310_v44  ;;  %v1576_v47 = vpack.c.bf16 %v1310_v44, %v1310_v44  ;;  %v1341_v48 = vmul.f32 %v1329_v32, %v1270_v45  ;;  %v1648_v50 = vpop.f32.mrb[3].mxu1  ;;  %v1345_v52 = vsel %vm1344_vm0, %v1339_v37, 0.0 }
 0x1c6   : > { %v1575_v49 = vpack.c.bf16 %v1270_v45, %v1268_v42  ;;  %v1343_v51 = vadd.f32 %v1338_v39, %v1337_v34 }
 0x1c7   : > { %1408 = vst.msk [vmem:[%s205_s10 + $0x14] sm:$0xf] %vm1405_vm15, %v1576_v47  ;;  %v1349_v53 = vadd.f32 %v1341_v48, %v1340_v43  ;;  %v1350_v55 = vsel %vm1344_vm0, %v1342_v46, 0.0 }
 0x1c8   : > { %1407 = vst [vmem:[%s205_s10 + $0xc] sm:$0xff] %v1575_v49  ;;  %v1346_v54 = vadd.f32 %v1345_v52, %v1343_v51 }
 0x1c9   : > { %v1351_v56 = vadd.f32 %v1350_v55, %v1349_v53 }
 0x1ca   : > { %1347 = vadd.xlane.f32.xlu0 %v1346_v54 }
 0x1cb   : > { %1352 = vadd.xlane.f32.xlu1 %v1351_v56 }
 0x257   : > { %v1348_v57 = vpop.xlane.xlu0 %1347 }
 0x258   : > { %v1354_v58 = vmul.f32 0.00390625, %v1348_v57  ;;  %v1353_v59 = vpop.xlane.xlu1 %1352 }
 0x259   : > { %v1355_v60 = vmul.f32 0.00390625, %v1353_v59 }
 0x25a   : > { %v1356_v61 = vsub.f32 %v1264_v33, %v1354_v58  ;;  %v1357_v62 = vsub.f32 %v1266_v36, %v1354_v58  ;;  %v1358_v63 = vsub.f32 %v1307_v35, %v1354_v58 }
 0x25b   : > { %v1359_v2 = vsub.f32 %v1268_v42, %v1355_v60  ;;  %v1360_v3 = vsub.f32 %v1270_v45, %v1355_v60  ;;  %v1361_v4 = vsub.f32 %v1310_v44, %v1355_v60 }
 0x25c   : > { %v1362_v5 = vmul.f32 %v1356_v61, %v1325_v31  ;;  %v1363_v6 = vmul.f32 %v1357_v62, %v1329_v32  ;;  %v1364_v7 = vmul.f32 %v1358_v63, %v1333_v0 }
 0x25d   : > { %v1365_v8 = vmul.f32 %v1359_v2, %v1325_v31  ;;  %v1366_v9 = vmul.f32 %v1360_v3, %v1329_v32  ;;  %v1367_v10 = vmul.f32 %v1361_v4, %v1333_v0 }
 0x25e   : > { %v1368_v11 = vmul.f32 %v1362_v5, %v1362_v5  ;;  %v1369_v12 = vmul.f32 %v1363_v6, %v1363_v6  ;;  %v1370_v13 = vmul.f32 %v1364_v7, %v1364_v7 }
 0x25f   : > { %v1371_v14 = vmul.f32 %v1365_v8, %v1365_v8  ;;  %v1372_v15 = vmul.f32 %v1366_v9, %v1366_v9  ;;  %v1373_v16 = vmul.f32 %v1367_v10, %v1367_v10 }
 0x260   : > { %v1374_v17 = vadd.f32 %v1369_v12, %v1368_v11  ;;  %v1375_v18 = vsel %vm1344_vm0, %v1370_v13, 0.0 }
 0x261   : > { %v1379_v19 = vadd.f32 %v1372_v15, %v1371_v14  ;;  %v1380_v20 = vsel %vm1344_vm0, %v1373_v16, 0.0 }
 0x262   : > { %v1376_v21 = vadd.f32 %v1375_v18, %v1374_v17 }
 0x263   : > { %v1381_v22 = vadd.f32 %v1380_v20, %v1379_v19 }
 0x264   : > { %1377 = vadd.xlane.f32.xlu0 %v1376_v21 }
 0x268   : > { %1382 = vadd.xlane.f32.xlu0 %v1381_v22 }
 0x2f1   : > { %v1378_v23 = vpop.xlane.xlu0 %1377 }
 0x2f2   : > { %v1409_v24 = vsel %vm598_vm6, %v1354_v58, %v1378_v23 }
 0x2f3   : > { %1412 = vst.msk [vmem:[%s210_s13] sm:$0xff] %vm1411_vm1, %v1409_v24 }
 0x2f5   : > { %v1383_v25 = vpop.xlane.xlu0 %1382 }
 0x2f6   : > { %v1410_v26 = vsel %vm598_vm6, %v1355_v60, %v1383_v25 }
 0x2f7   : > { %1413 = vst.msk [vmem:[%s210_s13 + $0x8] sm:$0xff] %vm1411_vm1, %v1410_v26 }
 0x2f8 PF: > { %s15_s15 = sadd.s32 1, %s1760_s15  }
 0x2f9   : > { %p12_p4 = scmp.ge.s32.totalorder %s15_s15, 4  }
 0x2fb   :  { %14 = sbr.rel (!%p12_p4) target bundleno = 1 (0x1), region = 82 }

// kernel: up_block_forward.4
= control target key start
LH: loop header
LB: loop body
LE: loop exit
PB: predicated region body
PF: predicated region fallthrough
CT: control target
= control target key end

     0   :  { %s1879_s21 = smov 0   ;;  %s2087_s0 = inlined_call_operand.vmem [shape: bf16[2,16,324], index: 0, kind: input, shape index: {}]   ;;  %s2088_s1 = inlined_call_operand.vmem [shape: bf16[9,16,16], index: 1, kind: input, shape index: {}]   ;;  %s2089_s2 = inlined_call_operand.vmem [shape: f32[1,324], index: 2, kind: input, shape index: {}]   ;;  %s2090_s3 = inlined_call_operand.vmem [shape: f32[16,1], index: 3, kind: input, shape index: {}]   ;;  %s2091_s4 = inlined_call_operand.vmem [shape: f32[16,1], index: 4, kind: input, shape index: {}]   ;;  %s2092_s5 = inlined_call_operand.vmem [shape: bf16[2,16,324], index: 5, kind: output, shape index: {0}]   ;;  %s2093_s6 = inlined_call_operand.vmem [shape: f32[2,16,2], index: 6, kind: output, shape index: {1}]  }
   0x1 LB: > { %s1570_s22 = sadd.s32 4294967295, %s1823_s21   ;;  %p1574_p0 = scmp.ge.s32.totalorder %s1823_s21, 1  ;;  %s1823_s21 = sphi %s1879_s21, %s17_s21  }
   0x2   : > { %p215_p1 = scmp.lt.s32.totalorder %s1823_s21, 3 }
   0x4   : > { %p216_p2 = pnand %p1574_p0, %p215_p1 }
   0x5   : > { %v295_v0 = vld [vmem:[%s2091_s4] sm:$0xff] (!%p216_p2)  ;;  %v1825_v2 = vmov (!%p216_p2), 0   ;;  %v296_v3 = vld [vmem:[%s2091_s4 + $0x8] sm:$0xff] (!%p216_p2)  ;;  %p250_p3 = scmp.lt.s32.totalorder (!%p216_p2), %s1570_s22, 1  ;;  %v321_v5 = vlaneseq (!%p216_p2)  ;;  %v1826_v39 = vmov (!%p216_p2), 0.0   ;;  %vm1827_vm3 = vmmov (!%p216_p2), 0  }
   0x6   : > { %219 = sbr.rel (%p216_p2) target bundleno = 889 (0x379), region = 40  ;;  %v277_v1 = vld [vmem:[%s2090_s3] sm:$0xff] (!%p216_p2)  ;;  %1807 = vset.pattern.permute.xlu1 (!%p216_p2), %v1825_v2  ;;  %1806 = vset.pattern.permute.xlu0 (!%p216_p2), %v1825_v2  ;;  %v278_v4 = vld [vmem:[%s2090_s3 + $0x8] sm:$0xff] (!%p216_p2)  ;;  %s1828_s13 = smov (!%p216_p2), 18   ;;  %vm376_vm5 = vcmask (!%p216_p2), 146432   ;;  %vm394_vm6 = vcmask (!%p216_p2), 130048  }
   0x7   : > { %299 = vperm.xlu1 (!%p216_p2), %1807, %v295_v0   ;;  %281 = vperm.xlu0 (!%p216_p2), %1806, %v277_v1   ;;  %v1913_v6 = vld [vmem:[%s2089_s2] sm:$0x7] (!%p216_p2)  ;;  %v1915_v8 = vshrl.u32 (!%p216_p2), %v321_v5, 7  ;;  %s1829_s14 = smov (!%p216_p2), 78   ;;  %s1830_s15 = smov (!%p216_p2), 19   ;;  %v1808_v1 = vld [vmem:[%s2088_s1 + $0x8] sm:$0xff] (!%p216_p2)  }
   0x8   : > { %430 = vmatprep.mubr.bf16.mxu0 (!%p216_p2), %v1825_v2  ;;  %vm319_vm0 = vcmp.gt.f32.partialorder (!%p216_p2), %v1913_v6, 0.5  ;;  %1660 = vmatprep.subr.bf16.mxu1 (!%p216_p2), %v1826_v39  ;;  %s1831_s16 = smov (!%p216_p2), 79   ;;  %s1832_s17 = smov (!%p216_p2), 17   ;;  %vm356_vm7 = vcmask (!%p216_p2), 154624   ;;  %vm582_vm8 = vcmask (!%p216_p2), 138240   ;;  %vm701_vm9 = vcmask (!%p216_p2), 7168  }
   0x9   : > { %v323_v14 = vsub.s32 (!%p216_p2), 0, %v1915_v8  ;;  %v320_v17 = vsel (!%p216_p2), %vm319_vm0, 1, %v1825_v2  ;;  %v327_v18 = vsub.s32 (!%p216_p2), 1, %v1915_v8  ;;  %v331_v25 = vsub.s32 (!%p216_p2), 2, %v1915_v8  ;;  %1662 = vmatprep.mubr.msk.bf16.mxu1 (!%p216_p2), %vm1827_vm3, %v1826_v39  ;;  %s1833_s18 = smov (!%p216_p2), 77   ;;  %s1834_s19 = smov (!%p216_p2), 1  }
   0xa   : > { %s1835_s20 = smov (!%p216_p2), 61   ;;  %s1836_s23 = smov (!%p216_p2), 127   ;;  %vm919_vm11 = vcmask (!%p216_p2), 1039360   ;;  %vm926_vm14 = vcmask (!%p216_p2), 547840   ;;  %vm1038_vm15 = vcmask (!%p216_p2), 908288   ;;  %vm1045_vm0 = vcmask (!%p216_p2), 416768  }
   0xb   : > { %304 = vperm.xlu1 (!%p216_p2), %1807, %v296_v3   ;;  %286 = vperm.xlu0 (!%p216_p2), %1806, %v278_v4   ;;  %v1924_v27 = vrot.slane (!%p216_p2), %v320_v17, %v323_v14  ;;  %v1928_v30 = vrot.slane (!%p216_p2), %v320_v17, %v327_v18  ;;  %v1932_v37 = vrot.slane (!%p216_p2), %v320_v17, %v331_v25  ;;  %s1837_s24 = smov (!%p216_p2), 67   ;;  %s1838_s25 = smov (!%p216_p2), 111  }
   0xc   : > { %s1839_s26 = smov (!%p216_p2), 51   ;;  %s1840_s27 = smov (!%p216_p2), 110  }
   0xd   : > { %s2095_s22 = smov (!%p250_p3, %s1570_s22), 1  ;;  %vm333_vm1 = vcmp.eq.s32.totalorder %v1924_v27, 1  ;;  %vm334_vm2 = vcmp.eq.s32.totalorder %v1928_v30, 1  ;;  %vm335_vm4 = vcmp.eq.s32.totalorder %v1932_v37, 1  ;;  %s1841_s28 = smov 50   ;;  %v1811_v30 = vld [vmem:[%s2088_s1 + $0x18] sm:$0xff]  }
   0xe   : > { %s1778_s7 = smul.u32 24, %s2095_s22  ;;  %s1842_s29 = smov 109   ;;  %vm1600_vm10 = vmpackc.low %vm334_vm2, %vm334_vm2 }
   0xf   : > { %s1843_s30 = smov 49   ;;  %vm1603_vm12 = vmpackc.low %vm333_vm1, %vm333_vm1 }
  0x10   : > { %s254_s10 = scalar_lea.vmem %s2087_s0, %s1778_s7  ;;  %vm1607_vm13 = vmpackc.low %vm335_vm4, %vm335_vm4 }
  0x11   : > { %v267_v7 = vld [vmem:[%s254_s10] sm:$0xff]  ;;  %v268_v9 = vld [vmem:[%s254_s10 + $0x8] ss:$12 sps:$4 sm:$0xff]   ;;  %v269_v13 = vld [vmem:[%s254_s10 + $0xc] sm:$0xff] }
  0x12   : > { %v271_v10 = vunpack.c.l.bf16 %v267_v7  ;;  %v272_v11 = vunpack.c.h.bf16 %v267_v7  ;;  %v273_v12 = vunpack.c.l.bf16 %v268_v9  ;;  %v274_v21 = vunpack.c.l.bf16 %v269_v13 }
  0x13   : > { %v275_v23 = vunpack.c.h.bf16 %v269_v13  ;;  %v276_v24 = vunpack.c.h.bf16 %v268_v9 }
  0x86   : > { %v300_v15 = vpop.permute.xlu1 %299  ;;  %v282_v16 = vpop.permute.xlu0 %281 }
  0x87   : > { %v289_v19 = vmul.f32 %v282_v16, %v271_v10  ;;  %v290_v20 = vmul.f32 %v282_v16, %v272_v11  ;;  %v291_v22 = vmul.f32 %v282_v16, %v273_v12  ;;  %v1809_v16 = vld [vmem:[%s2088_s1] sm:$0xff]  }
  0x89   : > { %v307_v26 = vadd.f32 %v300_v15, %v289_v19  ;;  %v308_v28 = vadd.f32 %v300_v15, %v290_v20  ;;  %v309_v32 = vadd.f32 %v300_v15, %v291_v22 }
  0x8a   : > { %v287_v29 = vpop.permute.xlu0 %286  ;;  %v305_v33 = vpop.permute.xlu1 %304 }
  0x8b   : > { %v292_v31 = vmul.f32 %v287_v29, %v274_v21  ;;  %v293_v34 = vmul.f32 %v287_v29, %v275_v23  ;;  %v294_v35 = vmul.f32 %v287_v29, %v276_v24  ;;  %v313_v36 = vmax.f32 %v307_v26, 0.0 }
  0x8c   : > { %v314_v40 = vmax.f32 %v308_v28, 0.0  ;;  %v315_v44 = vmax.f32 %v309_v32, 0.0  ;;  %v1810_v28 = vld [vmem:[%s2088_s1 + $0x10] sm:$0xff]  }
  0x8d   : > { %v310_v38 = vadd.f32 %v305_v33, %v292_v31  ;;  %v311_v41 = vadd.f32 %v305_v33, %v293_v34  ;;  %v312_v42 = vadd.f32 %v305_v33, %v294_v35  ;;  %v336_v47 = vsel %vm333_vm1, %v313_v36, 0.0 }
  0x8e   : > { %v337_v50 = vsel %vm334_vm2, %v314_v40, 0.0  ;;  %v338_v57 = vsel %vm335_vm4, %v315_v44, 0.0 }
  0x8f   : > { %v316_v43 = vmax.f32 %v310_v38, 0.0  ;;  %v317_v45 = vmax.f32 %v311_v41, 0.0  ;;  %v318_v46 = vmax.f32 %v312_v42, 0.0  ;;  %v1812_v38 = vld [vmem:[%s2088_s1 + $0x20] sm:$0xff]  }
  0x91   : > { %v339_v48 = vsel %vm333_vm1, %v316_v43, 0.0  ;;  %v1944_v49 = vpack.c.bf16 %v316_v43, %v313_v36  ;;  %v340_v51 = vsel %vm334_vm2, %v317_v45, 0.0  ;;  %v1950_v53 = vpack.c.bf16 %v318_v46, %v315_v44 }
  0x92   : > { %v342_v52 = vpack.c.bf16 %v339_v48, %v336_v47  ;;  %v341_v54 = vsel %vm335_vm4, %v318_v46, 0.0  ;;  %v343_v55 = vpack.c.bf16 %v340_v51, %v337_v50  ;;  %v1954_v56 = vpack.c.bf16 %v317_v45, %v314_v40  ;;  %v1813_v47 = vld [vmem:[%s2088_s1 + $0x28] sm:$0xff]  }
  0x93   : > { %v344_v58 = vpack.c.bf16 %v341_v54, %v338_v57  ;;  %vm1157_vm1 = vcmask 900096   ;;  %vm1164_vm2 = vcmask 408576   ;;  %vm1276_vm4 = vcmask 891904  }
  0x94   : > { %370 = vrot.lane.b32.xlu0 %v342_v52, %s1828_s13  ;;  %372 = vrot.lane.b32.xlu1 %v343_v55, %s1828_s13 }
  0x98   : > { %368 = vrot.lane.b32.xlu0 %v344_v58, %s1829_s14  ;;  %374 = vrot.lane.b32.xlu1 %v344_v58, %s1828_s13 }
  0x9c   : > { %350 = vrot.lane.b32.xlu0 %v342_v52, %s1830_s15  ;;  %352 = vrot.lane.b32.xlu1 %v343_v55, %s1830_s15 }
  0xa0   : > { %346 = vrot.lane.b32.xlu0 %v344_v58, %s1831_s16  ;;  %354 = vrot.lane.b32.xlu1 %v344_v58, %s1830_s15 }
  0xa4   : > { %576 = vrot.lane.b32.xlu0 %v342_v52, %s1832_s17  ;;  %578 = vrot.lane.b32.xlu1 %v343_v55, %s1832_s17 }
  0xa8   : > { %574 = vrot.lane.b32.xlu0 %v344_v58, %s1833_s18  ;;  %580 = vrot.lane.b32.xlu1 %v344_v58, %s1832_s17 }
  0xac   : > { %695 = vrot.lane.b32.xlu0 %v342_v52, %s1834_s19  ;;  %697 = vrot.lane.b32.xlu1 %v343_v55, %s1834_s19 }
  0xb0   : > { %693 = vrot.lane.b32.xlu0 %v344_v58, %s1835_s20  ;;  %699 = vrot.lane.b32.xlu1 %v344_v58, %s1834_s19 }
  0xb4   : > { %915 = vrot.lane.b32.xlu0 %v343_v55, %s1836_s23  ;;  %917 = vrot.lane.b32.xlu1 %v344_v58, %s1836_s23 }
  0xb8   : > { %913 = vrot.lane.b32.xlu0 %v342_v52, %s1836_s23  ;;  %924 = vrot.lane.b32.xlu1 %v342_v52, %s1837_s24 }
  0xbc   : > { %1034 = vrot.lane.b32.xlu0 %v343_v55, %s1838_s25  ;;  %1036 = vrot.lane.b32.xlu1 %v344_v58, %s1838_s25 }
  0xc0   : > { %1032 = vrot.lane.b32.xlu0 %v342_v52, %s1838_s25  ;;  %1043 = vrot.lane.b32.xlu1 %v342_v52, %s1839_s26 }
  0xc4   : > { %1153 = vrot.lane.b32.xlu0 %v343_v55, %s1840_s27  ;;  %1155 = vrot.lane.b32.xlu1 %v344_v58, %s1840_s27 }
  0xc8   : > { %1151 = vrot.lane.b32.xlu0 %v342_v52, %s1840_s27  ;;  %1162 = vrot.lane.b32.xlu1 %v342_v52, %s1841_s28 }
  0xcc   : > { %1272 = vrot.lane.b32.xlu0 %v343_v55, %s1842_s29  ;;  %1274 = vrot.lane.b32.xlu1 %v344_v58, %s1842_s29  ;;  %v1814_v55 = vld [vmem:[%s2088_s1 + $0x30] sm:$0xff]  }
  0xd0   : > { %1270 = vrot.lane.b32.xlu0 %v342_v52, %s1842_s29  ;;  %1281 = vrot.lane.b32.xlu1 %v342_v52, %s1843_s30  ;;  %s259_s30 = scalar_lea.vmem %s2092_s5, %s1778_s7  ;;  %s1637_s7 = sshll.u32 %s2095_s22, 4 }
  0xd1   : > { %s264_s10 = scalar_lea.vmem %s2093_s6, %s1637_s7 }
 0x106   : > { %v371_v59 = vpop.permute.xlu0 %370  ;;  %v373_v60 = vpop.permute.xlu1 %372 }
 0x107   : > { %v377_v61 = vsel %vm376_vm5, %v371_v59, %v373_v60 }
 0x108   : > { %398 = vmatprep.subr.bf16.mxu0 %v377_v61  ;;  %v1815_v61 = vld [vmem:[%s2088_s1 + $0x38] sm:$0xff]  }
 0x10a   : > { %v369_v62 = vpop.permute.xlu0 %368  ;;  %v375_v63 = vpop.permute.xlu1 %374 }
 0x10b   : > { %v384_v0 = vsel %vm376_vm5, %v369_v62, %v371_v59  ;;  %v378_v3 = vsel %vm376_vm5, %v373_v60, %v375_v63  ;;  %vm1283_vm5 = vcmask 400384  }
 0x10c   : > { %399 = vmatpush1.bf16.msra.mxu0 %v384_v0  ;;  %1661 = vmatpush3.bf16.msra.mxu1 %v378_v3  ;;  %v1816_v3 = vld [vmem:[%s2088_s1 + $0x40] sm:$0xff]  }
 0x10d   : > { %1666 = vmatprep.subr.bf16.mxu1 %v1826_v39 }
 0x10e   : > { %v351_v4 = vpop.permute.xlu0 %350  ;;  %v353_v5 = vpop.permute.xlu1 %352 }
 0x10f   : > { %1582 = vmatmul.mubr.msk.bf16.vlgmr.msra.gmra.mrb[0].mxu0 %vm394_vm6, %v1808_v1  ;;  %1663 = vmatmul.mubr.msk.bf16.vlgmr.msra.gmra.mrb[0].mxu1 %vm394_vm6, %v1808_v1  ;;  %v357_v7 = vsel %vm356_vm7, %v351_v4, %v353_v5 }
 0x110   : > { %522 = vmatprep.mubr.bf16.mxu0 %v1825_v2  ;;  %490 = vmatprep.subr.bf16.mxu0 %v357_v7 }
 0x111   : > { %1668 = vmatprep.mubr.msk.bf16.mxu1 %vm1827_vm3, %v1826_v39 }
 0x112   : > { %v347_v9 = vpop.permute.xlu0 %346  ;;  %v355_v10 = vpop.permute.xlu1 %354 }
 0x113   : > { %v364_v11 = vsel %vm356_vm7, %v347_v9, %v351_v4  ;;  %v358_v12 = vsel %vm356_vm7, %v353_v5, %v355_v10  ;;  %v1393_v4 = vrot.slane %v1913_v6, %v323_v14  ;;  %v1401_v5 = vrot.slane %v1913_v6, %v331_v25 }
 0x114   : > { %491 = vmatpush1.bf16.msra.mxu0 %v364_v11  ;;  %1667 = vmatpush3.bf16.msra.mxu1 %v358_v12  ;;  %vm1479_vm7 = vcmask 15360  }
 0x115   : > { %1672 = vmatprep.subr.bf16.mxu1 %v1826_v39 }
 0x116   : > { %v577_v13 = vpop.permute.xlu0 %576  ;;  %v579_v15 = vpop.permute.xlu1 %578 }
 0x117   : > { %v583_v17 = vsel %vm582_vm8, %v577_v13, %v579_v15 }
 0x118   : > { %603 = vmatprep.subr.bf16.mxu0 %v583_v17 }
 0x11a   : > { %v575_v19 = vpop.permute.xlu0 %574  ;;  %v581_v20 = vpop.permute.xlu1 %580 }
 0x11b   : > { %v590_v21 = vsel %vm582_vm8, %v575_v19, %v577_v13  ;;  %1585 = vmatmul.mubr.msk.bf16.vlgmr.msra.gmra.mrb[0].mxu0 %vm394_vm6, %v1809_v16  ;;  %v584_v22 = vsel %vm582_vm8, %v579_v15, %v581_v20  ;;  %1669 = vmatmul.mubr.msk.bf16.vlgmr.msra.gmra.mrb[0].mxu1 %vm394_vm6, %v1809_v16 }
 0x11c   : > { %604 = vmatpush1.bf16.msra.mxu0 %v590_v21  ;;  %1673 = vmatpush3.bf16.msra.mxu1 %v584_v22 }
 0x11d   : > { %1674 = vmatprep.mubr.msk.bf16.mxu1 %vm1827_vm3, %v1826_v39  ;;  %1678 = vmatprep.subr.bf16.mxu1 %v1826_v39 }
 0x11e   : > { %v696_v23 = vpop.permute.xlu0 %695  ;;  %635 = vmatprep.mubr.bf16.mxu0 %v1825_v2  ;;  %v698_v24 = vpop.permute.xlu1 %697 }
 0x11f   : > { %v702_v26 = vsel %vm701_vm9, %v696_v23, %v698_v24 }
 0x120   : > { %722 = vmatprep.subr.bf16.mxu0 %v702_v26 }
 0x122   : > { %v694_v29 = vpop.permute.xlu0 %693  ;;  %v700_v31 = vpop.permute.xlu1 %699 }
 0x123   : > { %v709_v32 = vsel %vm701_vm9, %v694_v29, %v696_v23  ;;  %v703_v33 = vsel %vm701_vm9, %v698_v24, %v700_v31 }
 0x126   : > { %v918_v34 = vpop.permute.xlu1 %917  ;;  %v916_v35 = vpop.permute.xlu0 %915 }
 0x127   : > { %1590 = vmatmul.mubr.msk.bf16.vlgmr.msra.gmra.mrb[0].mxu0 %vm394_vm6, %v1810_v28  ;;  %1675 = vmatmul.mubr.msk.bf16.vlgmr.msra.gmra.mrb[0].mxu1 %vm394_vm6, %v1810_v28  ;;  %v921_v36 = vsel %vm919_vm11, %v916_v35, %v918_v34 }
 0x128   : > { %723 = vmatpush1.bf16.msra.mxu0 %v709_v32  ;;  %1679 = vmatpush3.bf16.msra.mxu1 %v703_v33 }
 0x129   : > { %1602 = vmatprep.subr.msk.bf16.mxu0 %vm1600_vm10, %v1954_v56  ;;  %1680 = vmatprep.mubr.msk.bf16.mxu1 %vm1827_vm3, %v1826_v39 }
 0x12a   : > { %1684 = vmatprep.subr.bf16.mxu1 %v1826_v39  ;;  %754 = vmatprep.mubr.bf16.mxu0 %v1825_v2  ;;  %v925_v27 = vpop.permute.xlu1 %924  ;;  %v914_v37 = vpop.permute.xlu0 %913 }
 0x12b   : > { %v920_v42 = vsel %vm919_vm11, %v914_v37, %v916_v35  ;;  %v929_v43 = vsel %vm926_vm14, %v918_v34, %v925_v27 }
 0x12e   : > { %v1037_v40 = vpop.permute.xlu1 %1036  ;;  %v1035_v41 = vpop.permute.xlu0 %1034 }
 0x12f   : > { %v1040_v44 = vsel %vm1038_vm15, %v1035_v41, %v1037_v40 }
 0x132   : > { %v1044_v45 = vpop.permute.xlu1 %1043  ;;  %v1033_v46 = vpop.permute.xlu0 %1032 }
 0x133   : > { %1595 = vmatmul.mubr.msk.bf16.vlgmr.msra.gmra.mrb[0].mxu0 %vm394_vm6, %v1811_v30  ;;  %1681 = vmatmul.mubr.msk.bf16.vlgmr.msra.gmra.mrb[0].mxu1 %vm394_vm6, %v1811_v30  ;;  %v1039_v50 = vsel %vm1038_vm15, %v1033_v46, %v1035_v41  ;;  %v1048_v51 = vsel %vm1045_vm0, %v1037_v40, %v1044_v45 }
 0x134   : > { %1605 = vmatpush1.bf16.msk.msra.mxu0 %vm1603_vm12, %v1944_v49  ;;  %1685 = vmatpush3.bf16.msk.msra.mxu1 %vm1607_vm13, %v1950_v53 }
 0x135   : > { %942 = vmatprep.subr.bf16.mxu0 %v921_v36  ;;  %1686 = vmatprep.mubr.msk.bf16.mxu1 %vm1827_vm3, %v1826_v39 }
 0x136   : > { %1690 = vmatprep.subr.bf16.mxu1 %v1826_v39  ;;  %855 = vmatprep.mubr.bf16.mxu0 %v1825_v2  ;;  %v1156_v48 = vpop.permute.xlu1 %1155  ;;  %v1154_v49 = vpop.permute.xlu0 %1153 }
 0x137   : > { %v1159_v52 = vsel %vm1157_vm1, %v1154_v49, %v1156_v48 }
 0x13a   : > { %v1163_v53 = vpop.permute.xlu1 %1162  ;;  %v1152_v54 = vpop.permute.xlu0 %1151 }
 0x13b   : > { %v1158_v58 = vsel %vm1157_vm1, %v1152_v54, %v1154_v49  ;;  %v1167_v59 = vsel %vm1164_vm2, %v1156_v48, %v1163_v53 }
 0x13e   : > { %v1275_v56 = vpop.permute.xlu1 %1274  ;;  %v1273_v57 = vpop.permute.xlu0 %1272 }
 0x13f   : > { %1606 = vmatmul.mubr.msk.bf16.vlgmr.msra.gmra.mrb[0].mxu0 %vm394_vm6, %v1812_v38  ;;  %1687 = vmatmul.mubr.msk.bf16.vlgmr.msra.gmra.mrb[0].mxu1 %vm394_vm6, %v1812_v38  ;;  %v1278_v60 = vsel %vm1276_vm4, %v1273_v57, %v1275_v56 }
 0x140   : > { %943 = vmatpush1.bf16.msra.mxu0 %v920_v42  ;;  %1691 = vmatpush3.bf16.msra.mxu1 %v929_v43 }
 0x141   : > { %1061 = vmatprep.subr.bf16.mxu0 %v1040_v44  ;;  %974 = vmatprep.mubr.bf16.mxu0 %v1825_v2 }
 0x142   : > { %1692 = vmatprep.mubr.msk.bf16.mxu1 %vm1827_vm3, %v1826_v39  ;;  %1696 = vmatprep.subr.bf16.mxu1 %v1826_v39  ;;  %v1271_v62 = vpop.permute.xlu0 %1270  ;;  %v1282_v63 = vpop.permute.xlu1 %1281 }
 0x143   : > { %v1277_v0 = vsel %vm1276_vm4, %v1271_v62, %v1273_v57  ;;  %v1286_v1 = vsel %vm1283_vm5, %v1275_v56, %v1282_v63 }
 0x14b   : > { %1614 = vmatmul.mubr.msk.bf16.vlgmr.msra.gmra.mrb[0].mxu0 %vm394_vm6, %v1813_v47  ;;  %1693 = vmatmul.mubr.msk.bf16.vlgmr.msra.gmra.mrb[0].mxu1 %vm394_vm6, %v1813_v47 }
 0x14c   : > { %1062 = vmatpush1.bf16.msra.mxu0 %v1039_v50  ;;  %1697 = vmatpush3.bf16.msra.mxu1 %v1048_v51 }
 0x14d   : > { %1180 = vmatprep.subr.bf16.mxu0 %v1159_v52  ;;  %1093 = vmatprep.mubr.bf16.mxu0 %v1825_v2 }
 0x14e   : > { %1698 = vmatprep.mubr.msk.bf16.mxu1 %vm1827_vm3, %v1826_v39  ;;  %1702 = vmatprep.subr.bf16.mxu1 %v1826_v39 }
 0x157   : > { %1619 = vmatmul.mubr.msk.bf16.vlgmr.msra.gmra.mrb[0].mxu0 %vm394_vm6, %v1814_v55  ;;  %1699 = vmatmul.mubr.msk.bf16.vlgmr.msra.gmra.mrb[0].mxu1 %vm394_vm6, %v1814_v55 }
 0x158   : > { %1181 = vmatpush1.bf16.msra.mxu0 %v1158_v58  ;;  %1703 = vmatpush3.bf16.msra.mxu1 %v1167_v59 }
 0x159   : > { %1299 = vmatprep.subr.bf16.mxu0 %v1278_v60  ;;  %1212 = vmatprep.mubr.bf16.mxu0 %v1825_v2 }
 0x15a   : > { %1704 = vmatprep.mubr.msk.bf16.mxu1 %vm1827_vm3, %v1826_v39  ;;  %1708 = vmatprep.subr.bf16.mxu1 %v1826_v39 }
 0x163   : > { %1624 = vmatmul.mubr.msk.bf16.vlgmr.msra.gmra.mrb[0].mxu0 %vm394_vm6, %v1815_v61  ;;  %1705 = vmatmul.mubr.msk.bf16.vlgmr.msra.gmra.mrb[0].mxu1 %vm394_vm6, %v1815_v61 }
 0x164   : > { %1300 = vmatpush1.bf16.msra.mxu0 %v1277_v0  ;;  %1709 = vmatpush3.bf16.msra.mxu1 %v1286_v1 }
 0x165   : > { %1331 = vmatprep.mubr.bf16.mxu0 %v1825_v2  ;;  %1710 = vmatprep.mubr.msk.bf16.mxu1 %vm1827_vm3, %v1826_v39  ;;  %v1397_v2 = vrot.slane %v1913_v6, %v327_v18  ;;  %vm1473_vm3 = vcmask 551936  }
 0x16f   : > { %1629 = vmatmul.mubr.msk.bf16.vlgmr.msra.gmra.mrb[0].mxu0 %vm394_vm6, %v1816_v3  ;;  %1711 = vmatmul.mubr.msk.bf16.vlgmr.msra.gmra.mrb[0].mxu1 %vm394_vm6, %v1816_v3  ;;  %vm1412_vm6 = vcmask 556032  }
 0x242   : > { %v1333_v39 = vpop.f32.mrb[0].mxu0  ;;  %v1376_v9 = vpop.f32.mrb[0].mxu1 }
 0x243   : > { %v1405_v7 = vmul.f32 %v1393_v4, %v1333_v39  ;;  %v1335_v10 = vpop.f32.mrb[1].mxu0  ;;  %v1407_v11 = vmul.f32 %v1401_v5, %v1376_v9  ;;  %v1639_v14 = vpack.c.bf16 %v1376_v9, %v1376_v9  ;;  %v1712_v15 = vpop.f32.mrb[1].mxu1 }
 0x244   : > { %v1406_v12 = vmul.f32 %v1397_v2, %v1335_v10  ;;  %v1638_v13 = vpack.c.bf16 %v1335_v10, %v1333_v39  ;;  %v1337_v25 = vpop.f32.mrb[2].mxu0  ;;  %v1379_v8 = vpop.f32.mrb[2].mxu1 }
 0x245   : > { %v1408_v16 = vmul.f32 %v1393_v4, %v1337_v25  ;;  %v1339_v17 = vpop.f32.mrb[3].mxu0  ;;  %1474 = vst.msk [vmem:[%s259_s30 + $0x8] sm:$0xf] %vm1473_vm3, %v1639_v14  ;;  %v1410_v6 = vmul.f32 %v1401_v5, %v1379_v8  ;;  %v1641_v18 = vpack.c.bf16 %v1379_v8, %v1379_v8  ;;  %v1713_v21 = vpop.f32.mrb[3].mxu1  ;;  %v1413_v23 = vsel %vm1412_vm6, %v1407_v11, 0.0 }
 0x246   : > { %1472 = vst [vmem:[%s259_s30] sm:$0xff] %v1638_v13  ;;  %v1409_v19 = vmul.f32 %v1397_v2, %v1339_v17  ;;  %v1640_v20 = vpack.c.bf16 %v1339_v17, %v1337_v25  ;;  %v1411_v22 = vadd.f32 %v1406_v12, %v1405_v7 }
 0x247   : > { %1476 = vst.msk [vmem:[%s259_s30 + $0x14] sm:$0xf] %vm1473_vm3, %v1641_v18  ;;  %v1418_v28 = vsel %vm1412_vm6, %v1410_v6, 0.0 }
 0x248   : > { %1475 = vst [vmem:[%s259_s30 + $0xc] sm:$0xff] %v1640_v20  ;;  %v1417_v24 = vadd.f32 %v1409_v19, %v1408_v16  ;;  %v1414_v26 = vadd.f32 %v1413_v23, %v1411_v22 }
 0x24a   : > { %v1419_v29 = vadd.f32 %v1418_v28, %v1417_v24  ;;  %1415 = vadd.xlane.f32.xlu0 %v1414_v26 }
 0x24c   : > { %1420 = vadd.xlane.f32.xlu1 %v1419_v29 }
 0x2d7   : > { %v1416_v31 = vpop.xlane.xlu0 %1415 }
 0x2d8   : > { %v1422_v32 = vmul.f32 0.00390625, %v1416_v31 }
 0x2d9   : > { %v1421_v33 = vpop.xlane.xlu1 %1420 }
 0x2da   : > { %v1423_v30 = vmul.f32 0.00390625, %v1421_v33  ;;  %v1424_v34 = vsub.f32 %v1333_v39, %v1422_v32  ;;  %v1425_v35 = vsub.f32 %v1335_v10, %v1422_v32  ;;  %v1426_v36 = vsub.f32 %v1376_v9, %v1422_v32 }
 0x2dc   : > { %v1427_v27 = vsub.f32 %v1337_v25, %v1423_v30  ;;  %v1428_v37 = vsub.f32 %v1339_v17, %v1423_v30  ;;  %v1429_v38 = vsub.f32 %v1379_v8, %v1423_v30  ;;  %v1430_v40 = vmul.f32 %v1424_v34, %v1393_v4 }
 0x2dd   : > { %v1431_v41 = vmul.f32 %v1425_v35, %v1397_v2  ;;  %v1432_v42 = vmul.f32 %v1426_v36, %v1401_v5 }
 0x2de   : > { %v1433_v43 = vmul.f32 %v1427_v27, %v1393_v4  ;;  %v1434_v44 = vmul.f32 %v1428_v37, %v1397_v2  ;;  %v1435_v45 = vmul.f32 %v1429_v38, %v1401_v5  ;;  %v1436_v46 = vmul.f32 %v1430_v40, %v1430_v40 }
 0x2df   : > { %v1437_v47 = vmul.f32 %v1431_v41, %v1431_v41  ;;  %v1438_v48 = vmul.f32 %v1432_v42, %v1432_v42 }
 0x2e0   : > { %v1439_v49 = vmul.f32 %v1433_v43, %v1433_v43  ;;  %v1440_v50 = vmul.f32 %v1434_v44, %v1434_v44  ;;  %v1441_v51 = vmul.f32 %v1435_v45, %v1435_v45 }
 0x2e1   : > { %v1442_v52 = vadd.f32 %v1437_v47, %v1436_v46  ;;  %v1443_v53 = vsel %vm1412_vm6, %v1438_v48, 0.0 }
 0x2e2   : > { %v1447_v54 = vadd.f32 %v1440_v50, %v1439_v49  ;;  %v1448_v55 = vsel %vm1412_vm6, %v1441_v51, 0.0 }
 0x2e3   : > { %v1444_v56 = vadd.f32 %v1443_v53, %v1442_v52 }
 0x2e4   : > { %v1449_v57 = vadd.f32 %v1448_v55, %v1447_v54 }
 0x2e5   : > { %1445 = vadd.xlane.f32.xlu0 %v1444_v56 }
 0x2e9   : > { %1450 = vadd.xlane.f32.xlu0 %v1449_v57 }
 0x372   : > { %v1446_v58 = vpop.xlane.xlu0 %1445 }
 0x373   : > { %v1477_v59 = vsel %vm701_vm9, %v1422_v32, %v1446_v58 }
 0x374   : > { %1480 = vst.msk [vmem:[%s264_s10] sm:$0xff] %vm1479_vm7, %v1477_v59 }
 0x376   : > { %v1451_v60 = vpop.xlane.xlu0 %1450 }
 0x377   : > { %v1478_v61 = vsel %vm701_vm9, %v1423_v30, %v1451_v60 }
 0x378   : > { %1481 = vst.msk [vmem:[%s264_s10 + $0x8] sm:$0xff] %vm1479_vm7, %v1478_v61 }
 0x379 PF: > { %s17_s21 = sadd.s32 1, %s1823_s21  }
 0x37a   : > { %p14_p4 = scmp.ge.s32.totalorder %s17_s21, 4  }
 0x37c   :  { %16 = sbr.rel (!%p14_p4) target bundleno = 1 (0x1), region = 90 }

</bundles_post_ra>
